<compile_context>
chip_gen: v7x
topology: tpu7x:2x2x1
jax: 0.10.0
libtpu: 0.0.40
codegen_flags: <defaults>
</compile_context>

<pallas_src>
import functools
import math

import jax
import jax.numpy as jnp
from jax.experimental import pallas as pl
from jax.experimental.pallas import tpu as pltpu


def _round_up(n, m):
    return ((n + m - 1) // m) * m


def _tpu_generation():
    """Best-effort chip-generation detection from device_kind (e.g. 'TPU v6e')."""
    try:
        kind = jax.devices()[0].device_kind.lower()
        digits = [int(c) for c in kind if c.isdigit()]
        if digits:
            return digits[0]
    except Exception:
        pass
    return 6


def _vmem_capacity_bytes(gen):
    try:
        return int(pltpu.get_tpu_info().vmem_capacity_bytes)
    except Exception:
        return (64 << 20) if gen >= 7 else (128 << 20)


# --------------------------------------------------------------------------- #
# Fused kernel: whole MLP in a single pallas_call invocation per batch tile.
# refs layout: (w0, b0, w1, b1, ..., w_{L-1}, b_{L-1}, out_ref)
# --------------------------------------------------------------------------- #
def _fused_mlp_kernel(x_ref, *refs, n_layers, use_sigmoid):
    o_ref = refs[2 * n_layers]
    h = x_ref[...].astype(jnp.float32)                 # (TB, in_pad)
    for i in range(n_layers):                          # static unroll (fixed layer count)
        w = refs[2 * i][...]                           # (in_pad_i, out_pad_i), pre-transposed, bf16
        b = refs[2 * i + 1][...]                       # (1, out_pad_i), float32
        # Cast activations to the weight dtype (bf16 -> MXU-native), accumulate f32.
        y = jnp.dot(h.astype(w.dtype), w, preferred_element_type=jnp.float32) + b
        if i < n_layers - 1 or not use_sigmoid:
            h = jnp.maximum(y, 0.0)                    # ReLU (Dropout = identity in eval)
        else:
            h = jax.nn.sigmoid(y)                      # final Sigmoid (sizes[-1] == 1)
    o_ref[...] = h.astype(o_ref.dtype)


# --------------------------------------------------------------------------- #
# Parameter init (torch.nn.Linear default init) and one-time prep:
#   transpose to (in, out), zero-pad feature dims to lane alignment,
#   cast weights to bf16, reshape bias to (1, out_pad) f32.
# --------------------------------------------------------------------------- #
def init_net_params(sizes, key):
    params = []
    for i in range(len(sizes) - 1):
        fan_in, fan_out = sizes[i], sizes[i + 1]
        key, kw, kb = jax.random.split(key, 3)
        bound = 1.0 / math.sqrt(fan_in)
        w = jax.random.uniform(kw, (fan_out, fan_in), jnp.float32, -bound, bound)
        b = jax.random.uniform(kb, (fan_out,), jnp.float32, -bound, bound)
        params.append((w, b))
    return params


def prepare_params(params, *, param_dtype=jnp.bfloat16, lane_align=None):
    """One-time prep (free at init). bf16 weights by default (MXU-native,
    half the VMEM); f32 accumulation happens in the kernel. Feature dims are
    padded to 256 lanes on v6e/v7x (2x256^2 MXU), 128 on v5e."""
    if lane_align is None:
        lane_align = 256 if _tpu_generation() >= 6 else 128
    prepped = []
    for w, b in params:
        out_f, in_f = w.shape
        in_p, out_p = _round_up(in_f, lane_align), _round_up(out_f, lane_align)
        wt = jnp.zeros((in_p, out_p), jnp.float32).at[:in_f, :out_f].set(w.T)
        bp = jnp.zeros((1, out_p), jnp.float32).at[0, :out_f].set(b)
        prepped.append((wt.astype(param_dtype), bp))
    return prepped


# --------------------------------------------------------------------------- #
# Forward pass: single fused pallas_call, batch-tiled grid.
# --------------------------------------------------------------------------- #
def net_forward_fused(prepped, sizes, x, *, batch_tile=None, out_dtype=jnp.float32):
    gen = _tpu_generation()
    budget_cap = (_vmem_capacity_bytes(gen) * 3) // 4   # ~48 MiB v7x, ~96 MiB v5e/v6e

    x = x.astype(jnp.float32)
    batch, in_f = x.shape
    n_layers = len(prepped)
    last = sizes[-1]
    use_sigmoid = (last == 1)

    in_pad = prepped[0][0].shape[0]
    out_pad = prepped[-1][0].shape[1]
    max_pad = max([in_pad] + [w.shape[1] for w, _ in prepped])

    if batch_tile is None:
        # Bigger tiles amortize per-grid-step overhead on 128 MiB VMEM chips.
        batch_tile = 512 if gen >= 7 else 1024

    param_bytes = sum(int(w.size) * w.dtype.itemsize + int(b.size) * b.dtype.itemsize
                      for w, b in prepped)

    # Pad ONLY the feature dim (padded lanes hit zero weight rows); no batch
    # padding -> no extra HBM read+write pass over the input.
    if in_pad != in_f:
        x_p = jnp.zeros((batch, in_pad), jnp.float32).at[:, :in_f].set(x)
    else:
        x_p = x

    # Advisory cost estimate for XLA scheduling around the custom call.
    flops = int(2 * batch * sum(w.shape[0] * w.shape[1] for w, _ in prepped))
    transcendentals = int(batch * out_pad) if use_sigmoid else 0
    bytes_accessed = int(int(x_p.size) * 4
                         + batch * out_pad * jnp.dtype(out_dtype).itemsize
                         + param_bytes)

    kernel = functools.partial(_fused_mlp_kernel,
                               n_layers=n_layers, use_sigmoid=use_sigmoid)

    def build_and_run(use_buffered):
        # VMEM budget: resident params (single- or double-buffered), double-
        # buffered x/out tiles, in-flight activations (h f32 + y f32 + bf16
        # copy of h), plus 8 MiB headroom for Mosaic matmul scratch.
        param_vmem = param_bytes * (1 if use_buffered else 2)

        def tile_vmem(t):
            return 2 * t * (in_pad + out_pad) * 4 + 3 * t * max_pad * 4

        tb = max(_round_up(min(batch_tile, _round_up(batch, 8)), 8), 8)
        if gen >= 7 and batch >= 16:
            # Guarantee >= 2 grid steps so both v7x TensorCores get work.
            tb = min(tb, max(_round_up(pl.cdiv(batch, 2), 8), 8))
        while tb > 8 and param_vmem + tile_vmem(tb) + (8 << 20) > budget_cap:
            tb = max(_round_up(tb // 2, 8), 8)

        grid = (pl.cdiv(batch, tb),)   # ragged last tile: OOB rows discarded on write
        vmem_limit = int(min(param_vmem + tile_vmem(tb) + (8 << 20), budget_cap))

        def resident_spec(shape):
            if use_buffered:
                # Constant index_map -> block stays resident; Buffered(1)
                # avoids the default 2x buffering of the resident params.
                return pl.BlockSpec(shape, lambda i: (0, 0),
                                    pipeline_mode=pl.Buffered(1))
            return pl.BlockSpec(shape, lambda i: (0, 0))

        flat_params = []
        in_specs = [pl.BlockSpec((tb, in_pad), lambda i: (i, 0))]
        for wt, bp in prepped:
            flat_params.extend([wt, bp])
            in_specs.append(resident_spec(wt.shape))
            in_specs.append(resident_spec(bp.shape))

        out = pl.pallas_call(
            kernel,
            out_shape=jax.ShapeDtypeStruct((batch, out_pad), out_dtype),
            grid=grid,
            in_specs=in_specs,
            out_specs=pl.BlockSpec((tb, out_pad), lambda i: (i, 0)),
            compiler_params=pltpu.CompilerParams(
                dimension_semantics=("parallel",),
                vmem_limit_bytes=vmem_limit),
            cost_estimate=pl.CostEstimate(flops=flops,
                                          transcendentals=transcendentals,
                                          bytes_accessed=bytes_accessed),
        )(x_p, *flat_params)
        return jax.block_until_ready(out)

    try:
        out_p = build_and_run(use_buffered=True)
    except Exception:
        # Fallback if pl.Buffered(1) single-buffering is unavailable/rejected.
        out_p = build_and_run(use_buffered=False)

    # Slice off padded output lanes (sigmoid(0)=0.5 lives there).
    return out_p[:, :last]


if __name__ == "__main__":
    # Small shapes consistent with the module: MLP with hidden layers and a
    # single sigmoid output (sizes[-1] == 1 exercises the Sigmoid branch).
    sizes = [32, 64, 16, 1]
    batch = 8

    key = jax.random.PRNGKey(0)
    key, kx = jax.random.split(key)
    x = jax.random.normal(kx, (batch, sizes[0]), jnp.float32)

    params = init_net_params(sizes, key)
    prepped = prepare_params(params)     # bf16 weights, pre-transposed + lane-padded

    out = net_forward_fused(prepped, sizes, x)
    out = jax.block_until_ready(out)

    # Sanity: output shape and sigmoid range.
    assert out.shape == (batch, sizes[-1])
    assert bool(jnp.all(out >= 0.0)) and bool(jnp.all(out <= 1.0))

    # Pure-JAX f32 reference check against the original (unpadded) parameters.
    # Tolerance accounts for the bf16 weight/activation cast in the kernel.
    ref = x.astype(jnp.float32)
    for i, (w, b) in enumerate(params):
        ref = ref @ w.T + b
        if i < len(params) - 1 or sizes[-1] > 1:
            ref = jnp.maximum(ref, 0.0)
        else:
            ref = jax.nn.sigmoid(ref)
    max_err = float(jnp.max(jnp.abs(out - ref)))
    assert bool(jnp.allclose(out, ref, atol=2e-2, rtol=2e-2)), f"max abs err {max_err}"

    print("KERNEL_OK")
</pallas_src>

<mosaic_0001>
module attributes {stable_mosaic.version = 11 : i64} {
  func.func @_fused_mlp_kernel(%arg0: i32, %arg1: memref<8x256xf32, #tpu.memory_space<vmem>>, %arg2: memref<256x256xbf16, #tpu.memory_space<vmem>>, %arg3: memref<1x256xf32, #tpu.memory_space<vmem>>, %arg4: memref<256x256xbf16, #tpu.memory_space<vmem>>, %arg5: memref<1x256xf32, #tpu.memory_space<vmem>>, %arg6: memref<256x256xbf16, #tpu.memory_space<vmem>>, %arg7: memref<1x256xf32, #tpu.memory_space<vmem>>, %arg8: memref<8x256xf32, #tpu.memory_space<vmem>>) attributes {dimension_semantics = [#tpu.dimension_semantics<parallel>], iteration_bounds = array<i64: 1>, scalar_prefetch = 0 : i64, scratch_operands = 0 : i64, tpu.core_type = #tpu.core_type<tc>, window_params = [{transform_indices = @transform_0, window_bounds = array<i64: 8, 256>}, {pipeline_mode = #tpu.pipeline_mode<synchronous>, transform_indices = @transform_1, window_bounds = array<i64: 256, 256>}, {pipeline_mode = #tpu.pipeline_mode<synchronous>, transform_indices = @transform_2, window_bounds = array<i64: 1, 256>}, {pipeline_mode = #tpu.pipeline_mode<synchronous>, transform_indices = @transform_3, window_bounds = array<i64: 256, 256>}, {pipeline_mode = #tpu.pipeline_mode<synchronous>, transform_indices = @transform_4, window_bounds = array<i64: 1, 256>}, {pipeline_mode = #tpu.pipeline_mode<synchronous>, transform_indices = @transform_5, window_bounds = array<i64: 256, 256>}, {pipeline_mode = #tpu.pipeline_mode<synchronous>, transform_indices = @transform_6, window_bounds = array<i64: 1, 256>}, {transform_indices = @transform_7, window_bounds = array<i64: 8, 256>}]} {
    %c0 = arith.constant 0 : index
    %c0_0 = arith.constant 0 : index
    %0 = vector.load %arg1[%c0, %c0_0] : memref<8x256xf32, #tpu.memory_space<vmem>>, vector<8x256xf32>
    %c0_1 = arith.constant 0 : index
    %c0_2 = arith.constant 0 : index
    %1 = vector.load %arg2[%c0_1, %c0_2] : memref<256x256xbf16, #tpu.memory_space<vmem>>, vector<256x256xbf16>
    %c0_3 = arith.constant 0 : index
    %c0_4 = arith.constant 0 : index
    %2 = vector.load %arg3[%c0_3, %c0_4] : memref<1x256xf32, #tpu.memory_space<vmem>>, vector<1x256xf32>
    %3 = arith.truncf %0 : vector<8x256xf32> to vector<8x256xbf16>
    %cst = arith.constant dense<0.000000e+00> : vector<8x256xf32>
    %4 = tpu.matmul %3, %1, %cst {dimension_numbers = #tpu.dot_dimension_numbers<[1], [0], [0], [1], [0, 0, 1, 1], [], []>} : vector<8x256xbf16>, vector<256x256xbf16>, vector<8x256xf32> -> vector<8x256xf32>
    %5 = vector.broadcast %2 : vector<1x256xf32> to vector<8x256xf32>
    %6 = arith.addf %4, %5 : vector<8x256xf32>
    %cst_5 = arith.constant 0.000000e+00 : f32
    %7 = vector.broadcast %cst_5 : f32 to vector<8x256xf32>
    %8 = arith.maximumf %6, %7 : vector<8x256xf32>
    %c0_6 = arith.constant 0 : index
    %c0_7 = arith.constant 0 : index
    %9 = vector.load %arg4[%c0_6, %c0_7] : memref<256x256xbf16, #tpu.memory_space<vmem>>, vector<256x256xbf16>
    %c0_8 = arith.constant 0 : index
    %c0_9 = arith.constant 0 : index
    %10 = vector.load %arg5[%c0_8, %c0_9] : memref<1x256xf32, #tpu.memory_space<vmem>>, vector<1x256xf32>
    %11 = arith.truncf %8 : vector<8x256xf32> to vector<8x256xbf16>
    %cst_10 = arith.constant dense<0.000000e+00> : vector<8x256xf32>
    %12 = tpu.matmul %11, %9, %cst_10 {dimension_numbers = #tpu.dot_dimension_numbers<[1], [0], [0], [1], [0, 0, 1, 1], [], []>} : vector<8x256xbf16>, vector<256x256xbf16>, vector<8x256xf32> -> vector<8x256xf32>
    %13 = vector.broadcast %10 : vector<1x256xf32> to vector<8x256xf32>
    %14 = arith.addf %12, %13 : vector<8x256xf32>
    %cst_11 = arith.constant 0.000000e+00 : f32
    %15 = vector.broadcast %cst_11 : f32 to vector<8x256xf32>
    %16 = arith.maximumf %14, %15 : vector<8x256xf32>
    %c0_12 = arith.constant 0 : index
    %c0_13 = arith.constant 0 : index
    %17 = vector.load %arg6[%c0_12, %c0_13] : memref<256x256xbf16, #tpu.memory_space<vmem>>, vector<256x256xbf16>
    %c0_14 = arith.constant 0 : index
    %c0_15 = arith.constant 0 : index
    %18 = vector.load %arg7[%c0_14, %c0_15] : memref<1x256xf32, #tpu.memory_space<vmem>>, vector<1x256xf32>
    %19 = arith.truncf %16 : vector<8x256xf32> to vector<8x256xbf16>
    %cst_16 = arith.constant dense<0.000000e+00> : vector<8x256xf32>
    %20 = tpu.matmul %19, %17, %cst_16 {dimension_numbers = #tpu.dot_dimension_numbers<[1], [0], [0], [1], [0, 0, 1, 1], [], []>} : vector<8x256xbf16>, vector<256x256xbf16>, vector<8x256xf32> -> vector<8x256xf32>
    %21 = vector.broadcast %18 : vector<1x256xf32> to vector<8x256xf32>
    %22 = arith.addf %20, %21 : vector<8x256xf32>
    %23 = arith.negf %22 : vector<8x256xf32>
    %24 = math.exp %23 : vector<8x256xf32>
    %cst_17 = arith.constant 1.000000e+00 : f32
    %25 = vector.broadcast %cst_17 : f32 to vector<8x256xf32>
    %26 = arith.addf %25, %24 : vector<8x256xf32>
    %27 = arith.divf %25, %26 : vector<8x256xf32>
    %c0_18 = arith.constant 0 : index
    %c0_19 = arith.constant 0 : index
    %28 = vector.load %arg8[%c0_18, %c0_19] : memref<8x256xf32, #tpu.memory_space<vmem>>, vector<8x256xf32>
    tpu.vector_store %arg8[%c0_18, %c0_19], %27 {strides = array<i32>} : memref<8x256xf32, #tpu.memory_space<vmem>>, vector<8x256xf32>,
    return
  }
  func.func @transform_0(%arg0: i32) -> (i32, i32) {
    %c0_i32 = arith.constant 0 : i32
    %c0_i32_0 = arith.constant 0 : i32
    return %arg0, %c0_i32 : i32, i32
  }
  func.func @transform_1(%arg0: i32) -> (i32, i32) {
    %c0_i32 = arith.constant 0 : i32
    %c0_i32_0 = arith.constant 0 : i32
    %c0_i32_1 = arith.constant 0 : i32
    return %c0_i32, %c0_i32_0 : i32, i32
  }
  func.func @transform_2(%arg0: i32) -> (i32, i32) {
    %c0_i32 = arith.constant 0 : i32
    %c0_i32_0 = arith.constant 0 : i32
    %c0_i32_1 = arith.constant 0 : i32
    return %c0_i32, %c0_i32_0 : i32, i32
  }
  func.func @transform_3(%arg0: i32) -> (i32, i32) {
    %c0_i32 = arith.constant 0 : i32
    %c0_i32_0 = arith.constant 0 : i32
    %c0_i32_1 = arith.constant 0 : i32
    return %c0_i32, %c0_i32_0 : i32, i32
  }
  func.func @transform_4(%arg0: i32) -> (i32, i32) {
    %c0_i32 = arith.constant 0 : i32
    %c0_i32_0 = arith.constant 0 : i32
    %c0_i32_1 = arith.constant 0 : i32
    return %c0_i32, %c0_i32_0 : i32, i32
  }
  func.func @transform_5(%arg0: i32) -> (i32, i32) {
    %c0_i32 = arith.constant 0 : i32
    %c0_i32_0 = arith.constant 0 : i32
    %c0_i32_1 = arith.constant 0 : i32
    return %c0_i32, %c0_i32_0 : i32, i32
  }
  func.func @transform_6(%arg0: i32) -> (i32, i32) {
    %c0_i32 = arith.constant 0 : i32
    %c0_i32_0 = arith.constant 0 : i32
    %c0_i32_1 = arith.constant 0 : i32
    return %c0_i32, %c0_i32_0 : i32, i32
  }
  func.func @transform_7(%arg0: i32) -> (i32, i32) {
    %c0_i32 = arith.constant 0 : i32
    %c0_i32_0 = arith.constant 0 : i32
    return %arg0, %c0_i32 : i32, i32
  }
}

module attributes {stable_mosaic.version = 11 : i64} {
  func.func @_fused_mlp_kernel(%arg0: i32, %arg1: memref<8x256xf32, #tpu.memory_space<vmem>>, %arg2: memref<256x256xbf16, #tpu.memory_space<vmem>>, %arg3: memref<1x256xf32, #tpu.memory_space<vmem>>, %arg4: memref<256x256xbf16, #tpu.memory_space<vmem>>, %arg5: memref<1x256xf32, #tpu.memory_space<vmem>>, %arg6: memref<256x256xbf16, #tpu.memory_space<vmem>>, %arg7: memref<1x256xf32, #tpu.memory_space<vmem>>, %arg8: memref<8x256xf32, #tpu.memory_space<vmem>>) attributes {dimension_semantics = [#tpu.dimension_semantics<parallel>], iteration_bounds = array<i64: 1>, scalar_prefetch = 0 : i64, scratch_operands = 0 : i64, tpu.core_type = #tpu.core_type<tc>, window_params = [{transform_indices = @transform_0, window_bounds = array<i64: 8, 256>}, {pipeline_mode = #tpu.pipeline_mode<synchronous>, transform_indices = @transform_1, window_bounds = array<i64: 256, 256>}, {pipeline_mode = #tpu.pipeline_mode<synchronous>, transform_indices = @transform_2, window_bounds = array<i64: 1, 256>}, {pipeline_mode = #tpu.pipeline_mode<synchronous>, transform_indices = @transform_3, window_bounds = array<i64: 256, 256>}, {pipeline_mode = #tpu.pipeline_mode<synchronous>, transform_indices = @transform_4, window_bounds = array<i64: 1, 256>}, {pipeline_mode = #tpu.pipeline_mode<synchronous>, transform_indices = @transform_5, window_bounds = array<i64: 256, 256>}, {pipeline_mode = #tpu.pipeline_mode<synchronous>, transform_indices = @transform_6, window_bounds = array<i64: 1, 256>}, {transform_indices = @transform_7, window_bounds = array<i64: 8, 256>}]} {
    %c0 = arith.constant 0 : index
    %c0_0 = arith.constant 0 : index
    %0 = vector.load %arg1[%c0, %c0_0] : memref<8x256xf32, #tpu.memory_space<vmem>>, vector<8x256xf32>
    %c0_1 = arith.constant 0 : index
    %c0_2 = arith.constant 0 : index
    %1 = vector.load %arg2[%c0_1, %c0_2] : memref<256x256xbf16, #tpu.memory_space<vmem>>, vector<256x256xbf16>
    %c0_3 = arith.constant 0 : index
    %c0_4 = arith.constant 0 : index
    %2 = vector.load %arg3[%c0_3, %c0_4] : memref<1x256xf32, #tpu.memory_space<vmem>>, vector<1x256xf32>
    %3 = arith.truncf %0 : vector<8x256xf32> to vector<8x256xbf16>
    %cst = arith.constant dense<0.000000e+00> : vector<8x256xf32>
    %4 = tpu.matmul %3, %1, %cst {dimension_numbers = #tpu.dot_dimension_numbers<[1], [0], [0], [1], [0, 0, 1, 1], [], []>} : vector<8x256xbf16>, vector<256x256xbf16>, vector<8x256xf32> -> vector<8x256xf32>
    %5 = vector.broadcast %2 : vector<1x256xf32> to vector<8x256xf32>
    %6 = arith.addf %4, %5 : vector<8x256xf32>
    %cst_5 = arith.constant 0.000000e+00 : f32
    %7 = vector.broadcast %cst_5 : f32 to vector<8x256xf32>
    %8 = arith.maximumf %6, %7 : vector<8x256xf32>
    %c0_6 = arith.constant 0 : index
    %c0_7 = arith.constant 0 : index
    %9 = vector.load %arg4[%c0_6, %c0_7] : memref<256x256xbf16, #tpu.memory_space<vmem>>, vector<256x256xbf16>
    %c0_8 = arith.constant 0 : index
    %c0_9 = arith.constant 0 : index
    %10 = vector.load %arg5[%c0_8, %c0_9] : memref<1x256xf32, #tpu.memory_space<vmem>>, vector<1x256xf32>
    %11 = arith.truncf %8 : vector<8x256xf32> to vector<8x256xbf16>
    %cst_10 = arith.constant dense<0.000000e+00> : vector<8x256xf32>
    %12 = tpu.matmul %11, %9, %cst_10 {dimension_numbers = #tpu.dot_dimension_numbers<[1], [0], [0], [1], [0, 0, 1, 1], [], []>} : vector<8x256xbf16>, vector<256x256xbf16>, vector<8x256xf32> -> vector<8x256xf32>
    %13 = vector.broadcast %10 : vector<1x256xf32> to vector<8x256xf32>
    %14 = arith.addf %12, %13 : vector<8x256xf32>
    %cst_11 = arith.constant 0.000000e+00 : f32
    %15 = vector.broadcast %cst_11 : f32 to vector<8x256xf32>
    %16 = arith.maximumf %14, %15 : vector<8x256xf32>
    %c0_12 = arith.constant 0 : index
    %c0_13 = arith.constant 0 : index
    %17 = vector.load %arg6[%c0_12, %c0_13] : memref<256x256xbf16, #tpu.memory_space<vmem>>, vector<256x256xbf16>
    %c0_14 = arith.constant 0 : index
    %c0_15 = arith.constant 0 : index
    %18 = vector.load %arg7[%c0_14, %c0_15] : memref<1x256xf32, #tpu.memory_space<vmem>>, vector<1x256xf32>
    %19 = arith.truncf %16 : vector<8x256xf32> to vector<8x256xbf16>
    %cst_16 = arith.constant dense<0.000000e+00> : vector<8x256xf32>
    %20 = tpu.matmul %19, %17, %cst_16 {dimension_numbers = #tpu.dot_dimension_numbers<[1], [0], [0], [1], [0, 0, 1, 1], [], []>} : vector<8x256xbf16>, vector<256x256xbf16>, vector<8x256xf32> -> vector<8x256xf32>
    %21 = vector.broadcast %18 : vector<1x256xf32> to vector<8x256xf32>
    %22 = arith.addf %20, %21 : vector<8x256xf32>
    %23 = arith.negf %22 : vector<8x256xf32>
    %24 = math.exp %23 : vector<8x256xf32>
    %cst_17 = arith.constant 1.000000e+00 : f32
    %25 = vector.broadcast %cst_17 : f32 to vector<8x256xf32>
    %26 = arith.addf %25, %24 : vector<8x256xf32>
    %27 = arith.divf %25, %26 : vector<8x256xf32>
    %c0_18 = arith.constant 0 : index
    %c0_19 = arith.constant 0 : index
    %28 = vector.load %arg8[%c0_18, %c0_19] : memref<8x256xf32, #tpu.memory_space<vmem>>, vector<8x256xf32>
    tpu.vector_store %arg8[%c0_18, %c0_19], %27 {strides = array<i32>} : memref<8x256xf32, #tpu.memory_space<vmem>>, vector<8x256xf32>,
    return
  }
  func.func @transform_0(%arg0: i32) -> (i32, i32) {
    %c0_i32 = arith.constant 0 : i32
    %c0_i32_0 = arith.constant 0 : i32
    return %arg0, %c0_i32 : i32, i32
  }
  func.func @transform_1(%arg0: i32) -> (i32, i32) {
    %c0_i32 = arith.constant 0 : i32
    %c0_i32_0 = arith.constant 0 : i32
    %c0_i32_1 = arith.constant 0 : i32
    return %c0_i32, %c0_i32_0 : i32, i32
  }
  func.func @transform_2(%arg0: i32) -> (i32, i32) {
    %c0_i32 = arith.constant 0 : i32
    %c0_i32_0 = arith.constant 0 : i32
    %c0_i32_1 = arith.constant 0 : i32
    return %c0_i32, %c0_i32_0 : i32, i32
  }
  func.func @transform_3(%arg0: i32) -> (i32, i32) {
    %c0_i32 = arith.constant 0 : i32
    %c0_i32_0 = arith.constant 0 : i32
    %c0_i32_1 = arith.constant 0 : i32
    return %c0_i32, %c0_i32_0 : i32, i32
  }
  func.func @transform_4(%arg0: i32) -> (i32, i32) {
    %c0_i32 = arith.constant 0 : i32
    %c0_i32_0 = arith.constant 0 : i32
    %c0_i32_1 = arith.constant 0 : i32
    return %c0_i32, %c0_i32_0 : i32, i32
  }
  func.func @transform_5(%arg0: i32) -> (i32, i32) {
    %c0_i32 = arith.constant 0 : i32
    %c0_i32_0 = arith.constant 0 : i32
    %c0_i32_1 = arith.constant 0 : i32
    return %c0_i32, %c0_i32_0 : i32, i32
  }
  func.func @transform_6(%arg0: i32) -> (i32, i32) {
    %c0_i32 = arith.constant 0 : i32
    %c0_i32_0 = arith.constant 0 : i32
    %c0_i32_1 = arith.constant 0 : i32
    return %c0_i32, %c0_i32_0 : i32, i32
  }
  func.func @transform_7(%arg0: i32) -> (i32, i32) {
    %c0_i32 = arith.constant 0 : i32
    %c0_i32_0 = arith.constant 0 : i32
    return %arg0, %c0_i32 : i32, i32
  }
}

</mosaic_0001>

<bundles_post_ra>
// kernel: tpu_custom_call.1
= control target key start
LH: loop header
LB: loop body
LE: loop exit
PB: predicated region body
PF: predicated region fallthrough
CT: control target
= control target key end

     0   :  { %12 = vsyncpa [#allocation3], 0  ;;  %s1358_s0 = inlined_call_operand.hbm [shape: f32[8,256], index: 0, kind: input, shape index: {}]   ;;  %s1359_s1 = inlined_call_operand.hbm [shape: bf16[256,256], index: 1, kind: input, shape index: {}]   ;;  %s1360_s2 = inlined_call_operand.vmem [shape: f32[1,256], index: 2, kind: input, shape index: {}]   ;;  %s1361_s3 = inlined_call_operand.hbm [shape: bf16[256,256], index: 3, kind: input, shape index: {}]   ;;  %s1362_s4 = inlined_call_operand.vmem [shape: f32[1,256], index: 4, kind: input, shape index: {}]   ;;  %s1363_s5 = inlined_call_operand.hbm [shape: bf16[256,256], index: 5, kind: input, shape index: {}]   ;;  %s1364_s6 = inlined_call_operand.vmem [shape: f32[1,256], index: 6, kind: input, shape index: {}]   ;;  %s1365_s7 = inlined_call_operand.hbm [shape: f32[8,256], index: 7, kind: output, shape index: {}]  }
   0x1   :  { %13 = vsyncpa [#allocation6], 0 }
   0x2   :  { %14 = vsyncpa [#allocation9], 0 }
   0x3   :  { %15 = vsyncpa [#allocation4], 0  ;;  %s1233_s24 = smov [#allocation5]   ;;  %s1115_s28 = scalar_lea.hbm %s1359_s1, 4096 }
   0x4   :  { %s31_s25 = sshll.u32 %s1233_s24, 4  ;;  %p1116_p0 = scmp.ne.s32.totalorder %s1359_s1, %s1115_s28  ;;  %s32_s25 = int_to_ptr.vmem [resolvable:$true] %s31_s25 }
   0x5   :  { %p1119_p1 = scmp.lt.u32.totalorder %s1115_s28, %s1359_s1 }
   0x7   :  { %p1121_p2 = pnand %p1119_p1, %p1116_p0 }
   0x9   :  { %1124 = shalt.err (!%p1121_p2)
}
   0xa   :  { %s1125_s10 = scalar_lea.vmem %s32_s25, 4096  ;;  %p1130_p4 = scmp.lt.s32.totalorder %s32_s25, %s32_s25 }
   0xb   :  { %p1126_p3 = scmp.ne.s32.totalorder %s32_s25, %s1125_s10  ;;  %p1131_p5 = scmp.lt.s32.totalorder %s1125_s10, %s1125_s10 }
   0xd   :  { %p1132_p6 = por %p1131_p5, %p1130_p4 }
   0xf   :  { %p1133_p7 = pnand %p1132_p6, %p1126_p3 }
  0x11   :  { %1136 = shalt.err (!%p1133_p7)
}
  0x12   :  { %s1234_s11 = smov 128   ;;  %s1235_s12 = smov 8  }
  0x13   :  { %37 = dma.hbm_to_vmem [thread:$0]  %s1359_s1, 4096, %s32_s25, [#allocation6], %s1234_s11, %s1234_s11, %s1235_s12  }
  0x14   :  { %s1236_s15 = smov [#allocation2]   ;;  %s1237_s17 = smov [#allocation7]  }
  0x15   :  { %s22_s16 = sshll.u32 %s1236_s15, 4  ;;  %s45_s18 = sshll.u32 %s1237_s17, 4  ;;  %s23_s16 = int_to_ptr.vmem [resolvable:$true] %s22_s16  ;;  %s46_s18 = int_to_ptr.vmem [resolvable:$true] %s45_s18 }
  0x16   :  { %s1137_s21 = scalar_lea.hbm %s1358_s0, 256 }
  0x17   :  { %p1138_p8 = scmp.ne.s32.totalorder %s1358_s0, %s1137_s21  ;;  %p1141_p9 = scmp.lt.u32.totalorder %s1137_s21, %s1358_s0 }
  0x19   :  { %p1143_p10 = pnand %p1141_p9, %p1138_p8 }
  0x1b   :  { %1146 = shalt.err (!%p1143_p10)
}
  0x1c   :  { %s1147_s1 = scalar_lea.vmem %s23_s16, 256  ;;  %p1152_p12 = scmp.lt.s32.totalorder %s23_s16, %s23_s16 }
  0x1d   :  { %p1148_p11 = scmp.ne.s32.totalorder %s23_s16, %s1147_s1  ;;  %p1153_p13 = scmp.lt.s32.totalorder %s1147_s1, %s1147_s1 }
  0x1f   :  { %p1154_p0 = por %p1153_p13, %p1152_p12 }
  0x21   :  { %p1155_p1 = pnand %p1154_p0, %p1148_p11 }
  0x23   :  { %1158 = shalt.err (!%p1155_p1)
}
  0x24   :  { %25 = dma.hbm_to_vmem [thread:$0]  %s1358_s0, 256, %s23_s16, [#allocation3]  }
  0x25   :  { %s1159_s30 = scalar_lea.hbm %s1361_s3, 4096 }
  0x26   :  { %p1160_p2 = scmp.ne.s32.totalorder %s1361_s3, %s1159_s30  ;;  %p1163_p3 = scmp.lt.u32.totalorder %s1159_s30, %s1361_s3 }
  0x28   :  { %p1165_p4 = pnand %p1163_p3, %p1160_p2 }
  0x2a   :  { %1168 = shalt.err (!%p1165_p4)
}
  0x2b   :  { %s1169_s14 = scalar_lea.vmem %s46_s18, 4096  ;;  %p1174_p6 = scmp.lt.s32.totalorder %s46_s18, %s46_s18 }
  0x2c   :  { %p1170_p5 = scmp.ne.s32.totalorder %s46_s18, %s1169_s14  ;;  %p1175_p7 = scmp.lt.s32.totalorder %s1169_s14, %s1169_s14 }
  0x2e   :  { %p1176_p8 = por %p1175_p7, %p1174_p6 }
  0x30   :  { %p1177_p9 = pnand %p1176_p8, %p1170_p5 }
  0x32   :  { %1180 = shalt.err (!%p1177_p9)
}
  0x33   :  { %51 = dma.hbm_to_vmem [thread:$0]  %s1361_s3, 4096, %s46_s18, [#allocation6], %s1234_s11, %s1234_s11, %s1235_s12  }
  0x34   :  { %s1238_s16 = smov [#allocation8]   ;;  %s1181_s21 = scalar_lea.hbm %s1363_s5, 4096 }
  0x35   :  { %s59_s17 = sshll.u32 %s1238_s16, 4  ;;  %p1182_p10 = scmp.ne.s32.totalorder %s1363_s5, %s1181_s21  ;;  %s60_s17 = int_to_ptr.vmem [resolvable:$true] %s59_s17 }
  0x36   :  { %p1185_p11 = scmp.lt.u32.totalorder %s1181_s21, %s1363_s5 }
  0x38   :  { %p1187_p12 = pnand %p1185_p11, %p1182_p10 }
  0x3a   :  { %1190 = shalt.err (!%p1187_p12)
}
  0x3b   :  { %s1191_s1 = scalar_lea.vmem %s60_s17, 4096  ;;  %p1196_p0 = scmp.lt.s32.totalorder %s60_s17, %s60_s17 }
  0x3c   :  { %p1192_p13 = scmp.ne.s32.totalorder %s60_s17, %s1191_s1  ;;  %p1197_p1 = scmp.lt.s32.totalorder %s1191_s1, %s1191_s1 }
  0x3e   :  { %p1198_p2 = por %p1197_p1, %p1196_p0 }
  0x40   :  { %p1199_p3 = pnand %p1198_p2, %p1192_p13 }
  0x42   :  { %1202 = shalt.err (!%p1199_p3)
}
  0x43   :  { %65 = dma.hbm_to_vmem [thread:$0]  %s1363_s5, 4096, %s60_s17, [#allocation9], %s1234_s11, %s1234_s11, %s1235_s12  }
  0x44   :  { %1225 = dma.done.wait [#allocation3], 256  }
  0x45   :  { %1226 = vsyncadd [#allocation3], 4294967040 }
  0x46   :  { %1227 = dma.done.wait [#allocation6], 8192  }
  0x47   :  { %1228 = vsyncadd [#allocation6], 4294959104 }
  0x48   :  { %1229 = dma.done.wait [#allocation9], 4096  }
  0x49   :  { %1230 = vsyncadd [#allocation9], 4294963200  ;;  %v963_v0 = vld [vmem:[#allocation5 + $0x4] ss:$8 sps:$4 sm:$0xff]   ;;  %v965_v1 = vld [vmem:[#allocation5] ss:$8 sps:$4 sm:$0xff]  }
  0x4a   :  { %288 = vmatprep.subr.bf16.mxu0 %v963_v0  ;;  %v966_v2 = vld [vmem:[#allocation5 + $0x14] ss:$8 sps:$4 sm:$0xff]   ;;  %v968_v3 = vld [vmem:[#allocation5 + $0x10] ss:$8 sps:$4 sm:$0xff]   ;;  %v969_v4 = vld [vmem:[#allocation5 + $0x24] ss:$8 sps:$4 sm:$0xff]  }
  0x4b   :  { %289 = vmatpush1.bf16.msra.mxu0 %v965_v1  ;;  %v971_v5 = vld [vmem:[#allocation5 + $0x20] ss:$8 sps:$4 sm:$0xff]   ;;  %v972_v6 = vld [vmem:[#allocation5 + $0x34] ss:$8 sps:$4 sm:$0xff]   ;;  %v974_v7 = vld [vmem:[#allocation5 + $0x30] ss:$8 sps:$4 sm:$0xff]  }
  0x4c   :  { %290 = vmatprep.subr.bf16.mxu0 %v966_v2  ;;  %v975_v8 = vld [vmem:[#allocation5 + $0x44] ss:$8 sps:$4 sm:$0xff]   ;;  %v977_v9 = vld [vmem:[#allocation5 + $0x40] ss:$8 sps:$4 sm:$0xff]   ;;  %v978_v10 = vld [vmem:[#allocation5 + $0x54] ss:$8 sps:$4 sm:$0xff]  }
  0x4d   :  { %v980_v11 = vld [vmem:[#allocation5 + $0x50] ss:$8 sps:$4 sm:$0xff]   ;;  %v981_v12 = vld [vmem:[#allocation5 + $0x64] ss:$8 sps:$4 sm:$0xff]   ;;  %v983_v13 = vld [vmem:[#allocation5 + $0x60] ss:$8 sps:$4 sm:$0xff]  }
  0x4e   :  { %v81_v14 = vld [vmem:[#allocation2 + $0x8] sm:$0xff]  ;;  %v1011_v16 = vld [vmem:[#allocation7 + $0x4] ss:$8 sps:$4 sm:$0xff]   ;;  %v1013_v17 = vld [vmem:[#allocation7] ss:$8 sps:$4 sm:$0xff]  }
  0x4f   :  { %291 = vmatpush1.bf16.msra.mxu0 %v968_v3  ;;  %v116_v15 = vpack.c.bf16 %v81_v14, %v81_v14  ;;  %v984_v18 = vld [vmem:[#allocation5 + $0x74] ss:$8 sps:$4 sm:$0xff]   ;;  %v986_v20 = vld [vmem:[#allocation5 + $0x70] ss:$8 sps:$4 sm:$0xff]   ;;  %537 = vmatprep.subr.bf16.mxu1 %v1011_v16  ;;  %v1017_v22 = vld [vmem:[#allocation7 + $0x24] ss:$8 sps:$4 sm:$0xff]  }
  0x50   :  { %292 = vmatprep.subr.bf16.mxu0 %v969_v4  ;;  %v1014_v19 = vld [vmem:[#allocation7 + $0x14] ss:$8 sps:$4 sm:$0xff]   ;;  %538 = vmatpush1.bf16.msra.mxu1 %v1013_v17  ;;  %v1016_v21 = vld [vmem:[#allocation7 + $0x10] ss:$8 sps:$4 sm:$0xff]   ;;  %v987_v23 = vld [vmem:[#allocation5 + $0x84] ss:$8 sps:$4 sm:$0xff]  }
  0x51   :  { %320 = vmatprep.mubr.bf16.mxu0 %v116_v15  ;;  %539 = vmatprep.subr.bf16.mxu1 %v1014_v19  ;;  %v989_v24 = vld [vmem:[#allocation5 + $0x80] ss:$8 sps:$4 sm:$0xff]   ;;  %v1020_v26 = vld [vmem:[#allocation7 + $0x34] ss:$8 sps:$4 sm:$0xff]   ;;  %v992_v28 = vld [vmem:[#allocation5 + $0x90] ss:$8 sps:$4 sm:$0xff]  }
  0x52   :  { %v1019_v25 = vld [vmem:[#allocation7 + $0x20] ss:$8 sps:$4 sm:$0xff]   ;;  %v990_v27 = vld [vmem:[#allocation5 + $0x94] ss:$8 sps:$4 sm:$0xff]   ;;  %v1022_v29 = vld [vmem:[#allocation7 + $0x30] ss:$8 sps:$4 sm:$0xff]  }
  0x53   :  { %293 = vmatpush1.bf16.msra.mxu0 %v971_v5  ;;  %v1023_v30 = vld [vmem:[#allocation7 + $0x44] ss:$8 sps:$4 sm:$0xff]   ;;  %v995_v32 = vld [vmem:[#allocation5 + $0xa0] ss:$8 sps:$4 sm:$0xff]   ;;  %v1026_v34 = vld [vmem:[#allocation7 + $0x54] ss:$8 sps:$4 sm:$0xff]  }
  0x54   :  { %294 = vmatprep.subr.bf16.mxu0 %v972_v6  ;;  %540 = vmatpush1.bf16.msra.mxu1 %v1016_v21  ;;  %v993_v31 = vld [vmem:[#allocation5 + $0xa4] ss:$8 sps:$4 sm:$0xff]   ;;  %v1025_v33 = vld [vmem:[#allocation7 + $0x40] ss:$8 sps:$4 sm:$0xff]   ;;  %v996_v35 = vld [vmem:[#allocation5 + $0xb4] ss:$8 sps:$4 sm:$0xff]  }
  0x55   :  { %541 = vmatprep.subr.bf16.mxu1 %v1017_v22  ;;  %v1028_v36 = vld [vmem:[#allocation7 + $0x50] ss:$8 sps:$4 sm:$0xff]   ;;  %v1029_v38 = vld [vmem:[#allocation7 + $0x64] ss:$8 sps:$4 sm:$0xff]   ;;  %v1031_v40 = vld [vmem:[#allocation7 + $0x60] ss:$8 sps:$4 sm:$0xff]  }
  0x56   :  { %v998_v37 = vld [vmem:[#allocation5 + $0xb0] ss:$8 sps:$4 sm:$0xff]   ;;  %v999_v39 = vld [vmem:[#allocation5 + $0xc4] ss:$8 sps:$4 sm:$0xff]   ;;  %v1001_v41 = vld [vmem:[#allocation5 + $0xc0] ss:$8 sps:$4 sm:$0xff]  }
  0x57   :  { %295 = vmatpush1.bf16.msra.mxu0 %v974_v7  ;;  %v1032_v42 = vld [vmem:[#allocation7 + $0x74] ss:$8 sps:$4 sm:$0xff]   ;;  %v1034_v44 = vld [vmem:[#allocation7 + $0x70] ss:$8 sps:$4 sm:$0xff]   ;;  %v1035_v46 = vld [vmem:[#allocation7 + $0x84] ss:$8 sps:$4 sm:$0xff]  }
  0x58   :  { %296 = vmatprep.subr.bf16.mxu0 %v975_v8  ;;  %542 = vmatpush1.bf16.msra.mxu1 %v1019_v25  ;;  %v1002_v43 = vld [vmem:[#allocation5 + $0xd4] ss:$8 sps:$4 sm:$0xff]   ;;  %v1004_v45 = vld [vmem:[#allocation5 + $0xd0] ss:$8 sps:$4 sm:$0xff]   ;;  %v1005_v47 = vld [vmem:[#allocation5 + $0xe4] ss:$8 sps:$4 sm:$0xff]  }
  0x59   :  { %543 = vmatprep.subr.bf16.mxu1 %v1020_v26  ;;  %v1037_v48 = vld [vmem:[#allocation7 + $0x80] ss:$8 sps:$4 sm:$0xff]   ;;  %v1038_v50 = vld [vmem:[#allocation7 + $0x94] ss:$8 sps:$4 sm:$0xff]   ;;  %v1040_v52 = vld [vmem:[#allocation7 + $0x90] ss:$8 sps:$4 sm:$0xff]  }
  0x5a   :  { %v1007_v49 = vld [vmem:[#allocation5 + $0xe0] ss:$8 sps:$4 sm:$0xff]   ;;  %v1008_v51 = vld [vmem:[#allocation5 + $0xf4] ss:$8 sps:$4 sm:$0xff]   ;;  %v1010_v53 = vld [vmem:[#allocation5 + $0xf0] ss:$8 sps:$4 sm:$0xff]  }
  0x5b   :  { %297 = vmatpush1.bf16.msra.mxu0 %v977_v9  ;;  %v80_v54 = vld [vmem:[#allocation2] sm:$0xff]  ;;  %v1041_v55 = vld [vmem:[#allocation7 + $0xa4] ss:$8 sps:$4 sm:$0xff]   ;;  %v1043_v57 = vld [vmem:[#allocation7 + $0xa0] ss:$8 sps:$4 sm:$0xff]  }
  0x5c   :  { %298 = vmatprep.subr.bf16.mxu0 %v978_v10  ;;  %544 = vmatpush1.bf16.msra.mxu1 %v1022_v29  ;;  %v115_v56 = vpack.c.bf16 %v80_v54, %v80_v54  ;;  %v1044_v58 = vld [vmem:[#allocation7 + $0xb4] ss:$8 sps:$4 sm:$0xff]   ;;  %v1046_v59 = vld [vmem:[#allocation7 + $0xb0] ss:$8 sps:$4 sm:$0xff]   ;;  %v1047_v60 = vld [vmem:[#allocation7 + $0xc4] ss:$8 sps:$4 sm:$0xff]  }
  0x5d   :  { %545 = vmatprep.subr.bf16.mxu1 %v1023_v30  ;;  %v1049_v61 = vld [vmem:[#allocation7 + $0xc0] ss:$8 sps:$4 sm:$0xff]   ;;  %v1050_v62 = vld [vmem:[#allocation7 + $0xd4] ss:$8 sps:$4 sm:$0xff]   ;;  %v1052_v63 = vld [vmem:[#allocation7 + $0xd0] ss:$8 sps:$4 sm:$0xff]  }
  0x5e   :  { %v1053_v0 = vld [vmem:[#allocation7 + $0xe4] ss:$8 sps:$4 sm:$0xff]   ;;  %v1055_v1 = vld [vmem:[#allocation7 + $0xe0] ss:$8 sps:$4 sm:$0xff]   ;;  %v1056_v2 = vld [vmem:[#allocation7 + $0xf4] ss:$8 sps:$4 sm:$0xff]  }
  0x5f   :  { %299 = vmatpush1.bf16.msra.mxu0 %v980_v11  ;;  %v1058_v3 = vld [vmem:[#allocation7 + $0xf0] ss:$8 sps:$4 sm:$0xff]   ;;  %v1059_v4 = vld [vmem:[#allocation8] ss:$8 sps:$4 sm:$0xff]   ;;  %v1061_v5 = vld [vmem:[#allocation8 + $0x4] ss:$8 sps:$4 sm:$0xff]  }
  0x60   :  { %300 = vmatprep.subr.bf16.mxu0 %v981_v12  ;;  %546 = vmatpush1.bf16.msra.mxu1 %v1025_v33  ;;  %v1064_v6 = vld [vmem:[#allocation8 + $0x14] ss:$8 sps:$4 sm:$0xff]   ;;  %v1062_v7 = vld [vmem:[#allocation8 + $0x10] ss:$8 sps:$4 sm:$0xff]   ;;  %v1067_v8 = vld [vmem:[#allocation8 + $0x24] ss:$8 sps:$4 sm:$0xff]  }
  0x61   :  { %547 = vmatprep.subr.bf16.mxu1 %v1026_v34  ;;  %v1065_v9 = vld [vmem:[#allocation8 + $0x20] ss:$8 sps:$4 sm:$0xff]   ;;  %v1070_v10 = vld [vmem:[#allocation8 + $0x34] ss:$8 sps:$4 sm:$0xff]   ;;  %v1068_v11 = vld [vmem:[#allocation8 + $0x30] ss:$8 sps:$4 sm:$0xff]  }
  0x62   :  { %v1073_v12 = vld [vmem:[#allocation8 + $0x44] ss:$8 sps:$4 sm:$0xff]   ;;  %v1076_v14 = vld [vmem:[#allocation8 + $0x54] ss:$8 sps:$4 sm:$0xff]   ;;  %v1074_v15 = vld [vmem:[#allocation8 + $0x50] ss:$8 sps:$4 sm:$0xff]  }
  0x63   :  { %301 = vmatpush1.bf16.msra.mxu0 %v983_v13  ;;  %v1071_v13 = vld [vmem:[#allocation8 + $0x40] ss:$8 sps:$4 sm:$0xff]   ;;  %v1079_v16 = vld [vmem:[#allocation8 + $0x64] ss:$8 sps:$4 sm:$0xff]   ;;  %v1080_v19 = vld [vmem:[#allocation8 + $0x70] ss:$8 sps:$4 sm:$0xff]  }
  0x64   :  { %302 = vmatprep.subr.bf16.mxu0 %v984_v18  ;;  %548 = vmatpush1.bf16.msra.mxu1 %v1028_v36  ;;  %v1077_v17 = vld [vmem:[#allocation8 + $0x60] ss:$8 sps:$4 sm:$0xff]   ;;  %v1082_v18 = vld [vmem:[#allocation8 + $0x74] ss:$8 sps:$4 sm:$0xff]  }
  0x65   :  { %549 = vmatprep.subr.bf16.mxu1 %v1029_v38  ;;  %v1083_v21 = vld [vmem:[#allocation8 + $0x80] ss:$8 sps:$4 sm:$0xff]   ;;  %v1088_v22 = vld [vmem:[#allocation8 + $0x94] ss:$8 sps:$4 sm:$0xff]  }
  0x66   :  { %v1089_v25 = vld [vmem:[#allocation8 + $0xa0] ss:$8 sps:$4 sm:$0xff]   ;;  %v1094_v26 = vld [vmem:[#allocation8 + $0xb4] ss:$8 sps:$4 sm:$0xff]  }
  0x67   :  { %303 = vmatpush1.bf16.msra.mxu0 %v986_v20  ;;  %v1085_v20 = vld [vmem:[#allocation8 + $0x84] ss:$8 sps:$4 sm:$0xff]   ;;  %v1095_v29 = vld [vmem:[#allocation8 + $0xc0] ss:$8 sps:$4 sm:$0xff]   ;;  %v1100_v30 = vld [vmem:[#allocation8 + $0xd4] ss:$8 sps:$4 sm:$0xff]  }
  0x68   :  { %304 = vmatprep.subr.bf16.mxu0 %v987_v23  ;;  %550 = vmatpush1.bf16.msra.mxu1 %v1031_v40  ;;  %v1086_v23 = vld [vmem:[#allocation8 + $0x90] ss:$8 sps:$4 sm:$0xff]  }
  0x69   :  { %551 = vmatprep.subr.bf16.mxu1 %v1032_v42 }
  0x6b   :  { %305 = vmatpush1.bf16.msra.mxu0 %v989_v24  ;;  %v1091_v24 = vld [vmem:[#allocation8 + $0xa4] ss:$8 sps:$4 sm:$0xff]  }
  0x6c   :  { %306 = vmatprep.subr.bf16.mxu0 %v990_v27  ;;  %552 = vmatpush1.bf16.msra.mxu1 %v1034_v44  ;;  %v1092_v27 = vld [vmem:[#allocation8 + $0xb0] ss:$8 sps:$4 sm:$0xff]  }
  0x6d   :  { %553 = vmatprep.subr.bf16.mxu1 %v1035_v46 }
  0x6f   :  { %307 = vmatpush1.bf16.msra.mxu0 %v992_v28  ;;  %v1097_v28 = vld [vmem:[#allocation8 + $0xc4] ss:$8 sps:$4 sm:$0xff]  }
  0x70   :  { %308 = vmatprep.subr.bf16.mxu0 %v993_v31  ;;  %554 = vmatpush1.bf16.msra.mxu1 %v1037_v48  ;;  %v1098_v31 = vld [vmem:[#allocation8 + $0xd0] ss:$8 sps:$4 sm:$0xff]  }
  0x71   :  { %555 = vmatprep.subr.bf16.mxu1 %v1038_v50  ;;  %v1101_v50 = vld [vmem:[#allocation8 + $0xe0] ss:$8 sps:$4 sm:$0xff]  }
  0x73   :  { %309 = vmatpush1.bf16.msra.mxu0 %v995_v32  ;;  %v118_v32 = vlaneseq }
  0x74   :  { %310 = vmatprep.subr.bf16.mxu0 %v996_v35  ;;  %556 = vmatpush1.bf16.msra.mxu1 %v1040_v52  ;;  %v114_v35 = vld [vmem:[%s1360_s2] sm:$0x3] }
  0x75   :  { %557 = vmatprep.subr.bf16.mxu1 %v1041_v55  ;;  %v119_v33 = vshrl.u32 %v118_v32, 7  ;;  %v1104_v52 = vld [vmem:[#allocation8 + $0xf0] ss:$8 sps:$4 sm:$0xff]  }
  0x77   :  { %311 = vmatpush1.bf16.msra.mxu0 %v998_v37  ;;  %v120_v34 = vsub.s32 0, %v119_v33  ;;  %v124_v36 = vsub.s32 1, %v119_v33 }
  0x78   :  { %312 = vmatprep.subr.bf16.mxu0 %v999_v39  ;;  %558 = vmatpush1.bf16.msra.mxu1 %v1043_v57 }
  0x79   :  { %559 = vmatprep.subr.bf16.mxu1 %v1044_v58  ;;  %v121_v37 = vrot.slane %v114_v35, %v120_v34  ;;  %v125_v38 = vrot.slane %v114_v35, %v124_v36 }
  0x7b   :  { %313 = vmatpush1.bf16.msra.mxu0 %v1001_v41 }
  0x7c   :  { %314 = vmatprep.subr.bf16.mxu0 %v1002_v43  ;;  %560 = vmatpush1.bf16.msra.mxu1 %v1046_v59 }
  0x7d   :  { %561 = vmatprep.subr.bf16.mxu1 %v1047_v60 }
  0x7f   :  { %315 = vmatpush1.bf16.msra.mxu0 %v1004_v45 }
  0x80   :  { %316 = vmatprep.subr.bf16.mxu0 %v1005_v47  ;;  %562 = vmatpush1.bf16.msra.mxu1 %v1049_v61 }
  0x81   :  { %563 = vmatprep.subr.bf16.mxu1 %v1050_v62 }
  0x83   :  { %317 = vmatpush1.bf16.msra.mxu0 %v1007_v49  ;;  %v1103_v49 = vld [vmem:[#allocation8 + $0xe4] ss:$8 sps:$4 sm:$0xff]  }
  0x84   :  { %318 = vmatprep.subr.bf16.mxu0 %v1008_v51  ;;  %564 = vmatpush1.bf16.msra.mxu1 %v1052_v63  ;;  %v1106_v51 = vld [vmem:[#allocation8 + $0xf4] ss:$8 sps:$4 sm:$0xff]  }
  0x85   :  { %565 = vmatprep.subr.bf16.mxu1 %v1053_v0 }
  0x87   :  { %319 = vmatpush1.bf16.msra.mxu0 %v1010_v53  ;;  %v363_v53 = vld [vmem:[%s1362_s4] sm:$0x3]  ;;  %s1239_s4 = smov [#allocation10]  }
  0x88   :  { %566 = vmatpush1.bf16.msra.mxu1 %v1055_v1  ;;  %786 = vmatprep.subr.bf16.mxu0 %v1061_v5  ;;  %v370_v54 = vrot.slane %v363_v53, %v120_v34  ;;  %v374_v55 = vrot.slane %v363_v53, %v124_v36 }
  0x89   :  { %567 = vmatprep.subr.bf16.mxu1 %v1056_v2  ;;  %v612_v2 = vld [vmem:[%s1364_s6] sm:$0x3]  ;;  %s847_s6 = sshll.u32 %s1239_s4, 4  ;;  %s848_s6 = int_to_ptr.vmem [resolvable:$true] %s847_s6 }
  0x8a   :  { %321 = vmatmul.mubr.bf16.vlgmr.msra.gmra.mrb[0].mxu0 %v115_v56  ;;  %s1203_s28 = scalar_lea.vmem %s848_s6, 256  ;;  %p1208_p5 = scmp.lt.s32.totalorder %s848_s6, %s848_s6 }
  0x8b   :  { %787 = vmatpush1.bf16.msra.mxu0 %v1059_v4  ;;  %v623_v4 = vrot.slane %v612_v2, %v124_v36  ;;  %p1204_p4 = scmp.ne.s32.totalorder %s848_s6, %s1203_s28  ;;  %p1209_p6 = scmp.lt.s32.totalorder %s1203_s28, %s1203_s28 }
  0x8c   :  { %568 = vmatpush1.bf16.msra.mxu1 %v1058_v3  ;;  %788 = vmatprep.subr.bf16.mxu0 %v1064_v6  ;;  %v619_v3 = vrot.slane %v612_v2, %v120_v34 }
  0x8d   :  { %p1210_p7 = por %p1209_p6, %p1208_p5 }
  0x8f   :  { %789 = vmatpush1.bf16.msra.mxu0 %v1062_v7  ;;  %p1211_p8 = pnand %p1210_p7, %p1204_p4 }
  0x90   :  { %790 = vmatprep.subr.bf16.mxu0 %v1067_v8 }
  0x93   :  { %791 = vmatpush1.bf16.msra.mxu0 %v1065_v9 }
  0x94   :  { %792 = vmatprep.subr.bf16.mxu0 %v1070_v10 }
  0x97   :  { %793 = vmatpush1.bf16.msra.mxu0 %v1068_v11 }
  0x98   :  { %794 = vmatprep.subr.bf16.mxu0 %v1073_v12 }
  0x9b   :  { %795 = vmatpush1.bf16.msra.mxu0 %v1071_v13 }
  0x9c   :  { %796 = vmatprep.subr.bf16.mxu0 %v1076_v14 }
  0x9f   :  { %797 = vmatpush1.bf16.msra.mxu0 %v1074_v15 }
  0xa0   :  { %798 = vmatprep.subr.bf16.mxu0 %v1079_v16 }
  0xa3   :  { %799 = vmatpush1.bf16.msra.mxu0 %v1077_v17 }
  0xa4   :  { %800 = vmatprep.subr.bf16.mxu0 %v1082_v18 }
  0xa7   :  { %801 = vmatpush1.bf16.msra.mxu0 %v1080_v19 }
  0xa8   :  { %802 = vmatprep.subr.bf16.mxu0 %v1085_v20 }
  0xab   :  { %803 = vmatpush1.bf16.msra.mxu0 %v1083_v21 }
  0xac   :  { %804 = vmatprep.subr.bf16.mxu0 %v1088_v22 }
  0xaf   :  { %805 = vmatpush1.bf16.msra.mxu0 %v1086_v23 }
  0xb0   :  { %806 = vmatprep.subr.bf16.mxu0 %v1091_v24 }
  0xb3   :  { %807 = vmatpush1.bf16.msra.mxu0 %v1089_v25 }
  0xb4   :  { %808 = vmatprep.subr.bf16.mxu0 %v1094_v26 }
  0xb7   :  { %809 = vmatpush1.bf16.msra.mxu0 %v1092_v27 }
  0xb8   :  { %810 = vmatprep.subr.bf16.mxu0 %v1097_v28 }
  0xbb   :  { %811 = vmatpush1.bf16.msra.mxu0 %v1095_v29 }
  0xbc   :  { %812 = vmatprep.subr.bf16.mxu0 %v1100_v30 }
  0xbf   :  { %813 = vmatpush1.bf16.msra.mxu0 %v1098_v31 }
  0xc0   :  { %814 = vmatprep.subr.bf16.mxu0 %v1103_v49 }
  0xc3   :  { %815 = vmatpush1.bf16.msra.mxu0 %v1101_v50 }
  0xc4   :  { %816 = vmatprep.subr.bf16.mxu0 %v1106_v51 }
  0xc7   :  { %817 = vmatpush1.bf16.msra.mxu0 %v1104_v52 }
 0x15d   :  { %v322_v39 = vpop.f32.mrb[0].mxu0 }
 0x15e   :  { %v323_v40 = vadd.f32 %v322_v39, %v121_v37  ;;  %v324_v41 = vpop.f32.mrb[1].mxu0 }
 0x15f   :  { %v325_v42 = vadd.f32 %v324_v41, %v125_v38  ;;  %v326_v43 = vpop.f32.mrb[2].mxu0 }
 0x160   :  { %v329_v44 = vmax.f32 %v323_v40, 0.0  ;;  %v327_v45 = vpop.f32.mrb[3].mxu0 }
 0x161   :  { %v330_v46 = vmax.f32 %v325_v42, 0.0 }
 0x162   :  { %v364_v48 = vpack.c.bf16 %v329_v44, %v329_v44 }
 0x163   :  { %v365_v47 = vpack.c.bf16 %v330_v46, %v330_v46 }
 0x165   :  { %569 = vmatprep.mubr.bf16.mxu1 %v365_v47 }
 0x166   :  { %570 = vmatmul.mubr.bf16.vlgmr.msra.gmra.mrb[0].mxu1 %v364_v48 }
 0x239   :  { %v571_v56 = vpop.f32.mrb[0].mxu1 }
 0x23a   :  { %v572_v57 = vadd.f32 %v571_v56, %v370_v54  ;;  %v573_v58 = vpop.f32.mrb[1].mxu1 }
 0x23b   :  { %v574_v59 = vadd.f32 %v573_v58, %v374_v55  ;;  %v575_v60 = vpop.f32.mrb[2].mxu1 }
 0x23c   :  { %v578_v61 = vmax.f32 %v572_v57, 0.0  ;;  %v576_v62 = vpop.f32.mrb[3].mxu1 }
 0x23d   :  { %v579_v63 = vmax.f32 %v574_v59, 0.0 }
 0x23e   :  { %v613_v1 = vpack.c.bf16 %v578_v61, %v578_v61 }
 0x23f   :  { %v614_v0 = vpack.c.bf16 %v579_v63, %v579_v63 }
 0x241   :  { %818 = vmatprep.mubr.bf16.mxu0 %v614_v0 }
 0x242   :  { %819 = vmatmul.mubr.bf16.vlgmr.msra.gmra.mrb[4].mxu0 %v613_v1 }
 0x315   :  { %v820_v5 = vpop.f32.mrb[4].mxu0 }
 0x316   :  { %v821_v6 = vadd.f32 %v820_v5, %v619_v3  ;;  %v822_v7 = vpop.f32.mrb[5].mxu0 }
 0x317   :  { %v823_v8 = vadd.f32 %v822_v7, %v623_v4  ;;  %v824_v9 = vpop.f32.mrb[6].mxu0 }
 0x318   :  { %v954_v10 = vmul.f32 -1.442695, %v821_v6  ;;  %v825_v11 = vpop.f32.mrb[7].mxu0 }
 0x319   :  { %v955_v12 = vmul.f32 -1.442695, %v823_v8 }
 0x31a   :  { %1107 = vpow2.f32 %v954_v10 }
 0x31b   :  { %1109 = vpow2.f32 %v955_v12 }
 0x324   :  { %v1108_v13 = vpop.eup %1107 }
 0x325   :  { %v1110_v14 = vpop.eup %1109  ;;  %v833_v15 = vadd.f32 1.0, %v1108_v13 }
 0x326   :  { %v834_v16 = vadd.f32 1.0, %v1110_v14 }
 0x327   :  { %1111 = vrcp.f32 %v833_v15 }
 0x328   :  { %1113 = vrcp.f32 %v834_v16 }
 0x331   :  { %v1112_v17 = vpop.eup %1111 }
 0x332   :  { %v1114_v18 = vpop.eup %1113  ;;  %839 = vst [vmem:[#allocation10] sm:$0xff] %v1112_v17 }
 0x333   :  { %840 = vst [vmem:[#allocation10 + $0x8] sm:$0xff] %v1114_v18 }
 0x334   :  { %1214 = shalt.err (!%p1211_p8)
}
 0x335   :  { %s1215_s8 = scalar_lea.hbm %s1365_s7, 256 }
 0x336   :  { %p1216_p9 = scmp.ne.s32.totalorder %s1365_s7, %s1215_s8  ;;  %p1219_p10 = scmp.lt.u32.totalorder %s1215_s8, %s1365_s7 }
 0x338   :  { %p1221_p11 = pnand %p1219_p10, %p1216_p9 }
 0x33a   :  { %1224 = shalt.err (!%p1221_p11)
}
 0x33b   :  { %850 = dma.vmem_to_hbm [thread:$0]  %s848_s6, 256, %s1365_s7, [#allocation4]  }
 0x33c   :  { %1231 = dma.done.wait [#allocation4], 256  }
 0x33d   :  { %1232 = vsyncadd [#allocation4], 4294967040 }
 0x33e   :  { %854 = vsyncpa [#allocation3], 1 }
 0x33f   :  { %855 = vsyncpa [#allocation6], 1 }
 0x340   :  { %856 = vsyncpa [#allocation9], 1 }
 0x341   :  { %857 = vsyncpa [#allocation4], 1 }

// kernel: tpu_custom_call.1
= control target key start
LH: loop header
LB: loop body
LE: loop exit
PB: predicated region body
PF: predicated region fallthrough
CT: control target
= control target key end

     0   :  { %12 = vsyncpa [#allocation3], 0  ;;  %s1358_s0 = inlined_call_operand.hbm [shape: f32[8,256], index: 0, kind: input, shape index: {}]   ;;  %s1359_s1 = inlined_call_operand.hbm [shape: bf16[256,256], index: 1, kind: input, shape index: {}]   ;;  %s1360_s2 = inlined_call_operand.vmem [shape: f32[1,256], index: 2, kind: input, shape index: {}]   ;;  %s1361_s3 = inlined_call_operand.hbm [shape: bf16[256,256], index: 3, kind: input, shape index: {}]   ;;  %s1362_s4 = inlined_call_operand.vmem [shape: f32[1,256], index: 4, kind: input, shape index: {}]   ;;  %s1363_s5 = inlined_call_operand.hbm [shape: bf16[256,256], index: 5, kind: input, shape index: {}]   ;;  %s1364_s6 = inlined_call_operand.vmem [shape: f32[1,256], index: 6, kind: input, shape index: {}]   ;;  %s1365_s7 = inlined_call_operand.hbm [shape: f32[8,256], index: 7, kind: output, shape index: {}]  }
   0x1   :  { %13 = vsyncpa [#allocation6], 0 }
   0x2   :  { %14 = vsyncpa [#allocation9], 0 }
   0x3   :  { %15 = vsyncpa [#allocation4], 0  ;;  %s1233_s24 = smov [#allocation5]   ;;  %s1115_s28 = scalar_lea.hbm %s1359_s1, 4096 }
   0x4   :  { %s31_s25 = sshll.u32 %s1233_s24, 4  ;;  %p1116_p0 = scmp.ne.s32.totalorder %s1359_s1, %s1115_s28  ;;  %s32_s25 = int_to_ptr.vmem [resolvable:$true] %s31_s25 }
   0x5   :  { %p1119_p1 = scmp.lt.u32.totalorder %s1115_s28, %s1359_s1 }
   0x7   :  { %p1121_p2 = pnand %p1119_p1, %p1116_p0 }
   0x9   :  { %1124 = shalt.err (!%p1121_p2)
}
   0xa   :  { %s1125_s10 = scalar_lea.vmem %s32_s25, 4096  ;;  %p1130_p4 = scmp.lt.s32.totalorder %s32_s25, %s32_s25 }
   0xb   :  { %p1126_p3 = scmp.ne.s32.totalorder %s32_s25, %s1125_s10  ;;  %p1131_p5 = scmp.lt.s32.totalorder %s1125_s10, %s1125_s10 }
   0xd   :  { %p1132_p6 = por %p1131_p5, %p1130_p4 }
   0xf   :  { %p1133_p7 = pnand %p1132_p6, %p1126_p3 }
  0x11   :  { %1136 = shalt.err (!%p1133_p7)
}
  0x12   :  { %s1234_s11 = smov 128   ;;  %s1235_s12 = smov 8  }
  0x13   :  { %37 = dma.hbm_to_vmem [thread:$0]  %s1359_s1, 4096, %s32_s25, [#allocation6], %s1234_s11, %s1234_s11, %s1235_s12  }
  0x14   :  { %s1236_s15 = smov [#allocation2]   ;;  %s1237_s17 = smov [#allocation7]  }
  0x15   :  { %s22_s16 = sshll.u32 %s1236_s15, 4  ;;  %s45_s18 = sshll.u32 %s1237_s17, 4  ;;  %s23_s16 = int_to_ptr.vmem [resolvable:$true] %s22_s16  ;;  %s46_s18 = int_to_ptr.vmem [resolvable:$true] %s45_s18 }
  0x16   :  { %s1137_s21 = scalar_lea.hbm %s1358_s0, 256 }
  0x17   :  { %p1138_p8 = scmp.ne.s32.totalorder %s1358_s0, %s1137_s21  ;;  %p1141_p9 = scmp.lt.u32.totalorder %s1137_s21, %s1358_s0 }
  0x19   :  { %p1143_p10 = pnand %p1141_p9, %p1138_p8 }
  0x1b   :  { %1146 = shalt.err (!%p1143_p10)
}
  0x1c   :  { %s1147_s1 = scalar_lea.vmem %s23_s16, 256  ;;  %p1152_p12 = scmp.lt.s32.totalorder %s23_s16, %s23_s16 }
  0x1d   :  { %p1148_p11 = scmp.ne.s32.totalorder %s23_s16, %s1147_s1  ;;  %p1153_p13 = scmp.lt.s32.totalorder %s1147_s1, %s1147_s1 }
  0x1f   :  { %p1154_p0 = por %p1153_p13, %p1152_p12 }
  0x21   :  { %p1155_p1 = pnand %p1154_p0, %p1148_p11 }
  0x23   :  { %1158 = shalt.err (!%p1155_p1)
}
  0x24   :  { %25 = dma.hbm_to_vmem [thread:$0]  %s1358_s0, 256, %s23_s16, [#allocation3]  }
  0x25   :  { %s1159_s30 = scalar_lea.hbm %s1361_s3, 4096 }
  0x26   :  { %p1160_p2 = scmp.ne.s32.totalorder %s1361_s3, %s1159_s30  ;;  %p1163_p3 = scmp.lt.u32.totalorder %s1159_s30, %s1361_s3 }
  0x28   :  { %p1165_p4 = pnand %p1163_p3, %p1160_p2 }
  0x2a   :  { %1168 = shalt.err (!%p1165_p4)
}
  0x2b   :  { %s1169_s14 = scalar_lea.vmem %s46_s18, 4096  ;;  %p1174_p6 = scmp.lt.s32.totalorder %s46_s18, %s46_s18 }
  0x2c   :  { %p1170_p5 = scmp.ne.s32.totalorder %s46_s18, %s1169_s14  ;;  %p1175_p7 = scmp.lt.s32.totalorder %s1169_s14, %s1169_s14 }
  0x2e   :  { %p1176_p8 = por %p1175_p7, %p1174_p6 }
  0x30   :  { %p1177_p9 = pnand %p1176_p8, %p1170_p5 }
  0x32   :  { %1180 = shalt.err (!%p1177_p9)
}
  0x33   :  { %51 = dma.hbm_to_vmem [thread:$0]  %s1361_s3, 4096, %s46_s18, [#allocation6], %s1234_s11, %s1234_s11, %s1235_s12  }
  0x34   :  { %s1238_s16 = smov [#allocation8]   ;;  %s1181_s21 = scalar_lea.hbm %s1363_s5, 4096 }
  0x35   :  { %s59_s17 = sshll.u32 %s1238_s16, 4  ;;  %p1182_p10 = scmp.ne.s32.totalorder %s1363_s5, %s1181_s21  ;;  %s60_s17 = int_to_ptr.vmem [resolvable:$true] %s59_s17 }
  0x36   :  { %p1185_p11 = scmp.lt.u32.totalorder %s1181_s21, %s1363_s5 }
  0x38   :  { %p1187_p12 = pnand %p1185_p11, %p1182_p10 }
  0x3a   :  { %1190 = shalt.err (!%p1187_p12)
}
  0x3b   :  { %s1191_s1 = scalar_lea.vmem %s60_s17, 4096  ;;  %p1196_p0 = scmp.lt.s32.totalorder %s60_s17, %s60_s17 }
  0x3c   :  { %p1192_p13 = scmp.ne.s32.totalorder %s60_s17, %s1191_s1  ;;  %p1197_p1 = scmp.lt.s32.totalorder %s1191_s1, %s1191_s1 }
  0x3e   :  { %p1198_p2 = por %p1197_p1, %p1196_p0 }
  0x40   :  { %p1199_p3 = pnand %p1198_p2, %p1192_p13 }
  0x42   :  { %1202 = shalt.err (!%p1199_p3)
}
  0x43   :  { %65 = dma.hbm_to_vmem [thread:$0]  %s1363_s5, 4096, %s60_s17, [#allocation9], %s1234_s11, %s1234_s11, %s1235_s12  }
  0x44   :  { %1225 = dma.done.wait [#allocation3], 256  }
  0x45   :  { %1226 = vsyncadd [#allocation3], 4294967040 }
  0x46   :  { %1227 = dma.done.wait [#allocation6], 8192  }
  0x47   :  { %1228 = vsyncadd [#allocation6], 4294959104 }
  0x48   :  { %1229 = dma.done.wait [#allocation9], 4096  }
  0x49   :  { %1230 = vsyncadd [#allocation9], 4294963200  ;;  %v963_v0 = vld [vmem:[#allocation5 + $0x4] ss:$8 sps:$4 sm:$0xff]   ;;  %v965_v1 = vld [vmem:[#allocation5] ss:$8 sps:$4 sm:$0xff]  }
  0x4a   :  { %288 = vmatprep.subr.bf16.mxu0 %v963_v0  ;;  %v966_v2 = vld [vmem:[#allocation5 + $0x14] ss:$8 sps:$4 sm:$0xff]   ;;  %v968_v3 = vld [vmem:[#allocation5 + $0x10] ss:$8 sps:$4 sm:$0xff]   ;;  %v969_v4 = vld [vmem:[#allocation5 + $0x24] ss:$8 sps:$4 sm:$0xff]  }
  0x4b   :  { %289 = vmatpush1.bf16.msra.mxu0 %v965_v1  ;;  %v971_v5 = vld [vmem:[#allocation5 + $0x20] ss:$8 sps:$4 sm:$0xff]   ;;  %v972_v6 = vld [vmem:[#allocation5 + $0x34] ss:$8 sps:$4 sm:$0xff]   ;;  %v974_v7 = vld [vmem:[#allocation5 + $0x30] ss:$8 sps:$4 sm:$0xff]  }
  0x4c   :  { %290 = vmatprep.subr.bf16.mxu0 %v966_v2  ;;  %v975_v8 = vld [vmem:[#allocation5 + $0x44] ss:$8 sps:$4 sm:$0xff]   ;;  %v977_v9 = vld [vmem:[#allocation5 + $0x40] ss:$8 sps:$4 sm:$0xff]   ;;  %v978_v10 = vld [vmem:[#allocation5 + $0x54] ss:$8 sps:$4 sm:$0xff]  }
  0x4d   :  { %v980_v11 = vld [vmem:[#allocation5 + $0x50] ss:$8 sps:$4 sm:$0xff]   ;;  %v981_v12 = vld [vmem:[#allocation5 + $0x64] ss:$8 sps:$4 sm:$0xff]   ;;  %v983_v13 = vld [vmem:[#allocation5 + $0x60] ss:$8 sps:$4 sm:$0xff]  }
  0x4e   :  { %v81_v14 = vld [vmem:[#allocation2 + $0x8] sm:$0xff]  ;;  %v1011_v16 = vld [vmem:[#allocation7 + $0x4] ss:$8 sps:$4 sm:$0xff]   ;;  %v1013_v17 = vld [vmem:[#allocation7] ss:$8 sps:$4 sm:$0xff]  }
  0x4f   :  { %291 = vmatpush1.bf16.msra.mxu0 %v968_v3  ;;  %v116_v15 = vpack.c.bf16 %v81_v14, %v81_v14  ;;  %v984_v18 = vld [vmem:[#allocation5 + $0x74] ss:$8 sps:$4 sm:$0xff]   ;;  %v986_v20 = vld [vmem:[#allocation5 + $0x70] ss:$8 sps:$4 sm:$0xff]   ;;  %537 = vmatprep.subr.bf16.mxu1 %v1011_v16  ;;  %v1017_v22 = vld [vmem:[#allocation7 + $0x24] ss:$8 sps:$4 sm:$0xff]  }
  0x50   :  { %292 = vmatprep.subr.bf16.mxu0 %v969_v4  ;;  %v1014_v19 = vld [vmem:[#allocation7 + $0x14] ss:$8 sps:$4 sm:$0xff]   ;;  %538 = vmatpush1.bf16.msra.mxu1 %v1013_v17  ;;  %v1016_v21 = vld [vmem:[#allocation7 + $0x10] ss:$8 sps:$4 sm:$0xff]   ;;  %v987_v23 = vld [vmem:[#allocation5 + $0x84] ss:$8 sps:$4 sm:$0xff]  }
  0x51   :  { %320 = vmatprep.mubr.bf16.mxu0 %v116_v15  ;;  %539 = vmatprep.subr.bf16.mxu1 %v1014_v19  ;;  %v989_v24 = vld [vmem:[#allocation5 + $0x80] ss:$8 sps:$4 sm:$0xff]   ;;  %v1020_v26 = vld [vmem:[#allocation7 + $0x34] ss:$8 sps:$4 sm:$0xff]   ;;  %v992_v28 = vld [vmem:[#allocation5 + $0x90] ss:$8 sps:$4 sm:$0xff]  }
  0x52   :  { %v1019_v25 = vld [vmem:[#allocation7 + $0x20] ss:$8 sps:$4 sm:$0xff]   ;;  %v990_v27 = vld [vmem:[#allocation5 + $0x94] ss:$8 sps:$4 sm:$0xff]   ;;  %v1022_v29 = vld [vmem:[#allocation7 + $0x30] ss:$8 sps:$4 sm:$0xff]  }
  0x53   :  { %293 = vmatpush1.bf16.msra.mxu0 %v971_v5  ;;  %v1023_v30 = vld [vmem:[#allocation7 + $0x44] ss:$8 sps:$4 sm:$0xff]   ;;  %v995_v32 = vld [vmem:[#allocation5 + $0xa0] ss:$8 sps:$4 sm:$0xff]   ;;  %v1026_v34 = vld [vmem:[#allocation7 + $0x54] ss:$8 sps:$4 sm:$0xff]  }
  0x54   :  { %294 = vmatprep.subr.bf16.mxu0 %v972_v6  ;;  %540 = vmatpush1.bf16.msra.mxu1 %v1016_v21  ;;  %v993_v31 = vld [vmem:[#allocation5 + $0xa4] ss:$8 sps:$4 sm:$0xff]   ;;  %v1025_v33 = vld [vmem:[#allocation7 + $0x40] ss:$8 sps:$4 sm:$0xff]   ;;  %v996_v35 = vld [vmem:[#allocation5 + $0xb4] ss:$8 sps:$4 sm:$0xff]  }
  0x55   :  { %541 = vmatprep.subr.bf16.mxu1 %v1017_v22  ;;  %v1028_v36 = vld [vmem:[#allocation7 + $0x50] ss:$8 sps:$4 sm:$0xff]   ;;  %v1029_v38 = vld [vmem:[#allocation7 + $0x64] ss:$8 sps:$4 sm:$0xff]   ;;  %v1031_v40 = vld [vmem:[#allocation7 + $0x60] ss:$8 sps:$4 sm:$0xff]  }
  0x56   :  { %v998_v37 = vld [vmem:[#allocation5 + $0xb0] ss:$8 sps:$4 sm:$0xff]   ;;  %v999_v39 = vld [vmem:[#allocation5 + $0xc4] ss:$8 sps:$4 sm:$0xff]   ;;  %v1001_v41 = vld [vmem:[#allocation5 + $0xc0] ss:$8 sps:$4 sm:$0xff]  }
  0x57   :  { %295 = vmatpush1.bf16.msra.mxu0 %v974_v7  ;;  %v1032_v42 = vld [vmem:[#allocation7 + $0x74] ss:$8 sps:$4 sm:$0xff]   ;;  %v1034_v44 = vld [vmem:[#allocation7 + $0x70] ss:$8 sps:$4 sm:$0xff]   ;;  %v1035_v46 = vld [vmem:[#allocation7 + $0x84] ss:$8 sps:$4 sm:$0xff]  }
  0x58   :  { %296 = vmatprep.subr.bf16.mxu0 %v975_v8  ;;  %542 = vmatpush1.bf16.msra.mxu1 %v1019_v25  ;;  %v1002_v43 = vld [vmem:[#allocation5 + $0xd4] ss:$8 sps:$4 sm:$0xff]   ;;  %v1004_v45 = vld [vmem:[#allocation5 + $0xd0] ss:$8 sps:$4 sm:$0xff]   ;;  %v1005_v47 = vld [vmem:[#allocation5 + $0xe4] ss:$8 sps:$4 sm:$0xff]  }
  0x59   :  { %543 = vmatprep.subr.bf16.mxu1 %v1020_v26  ;;  %v1037_v48 = vld [vmem:[#allocation7 + $0x80] ss:$8 sps:$4 sm:$0xff]   ;;  %v1038_v50 = vld [vmem:[#allocation7 + $0x94] ss:$8 sps:$4 sm:$0xff]   ;;  %v1040_v52 = vld [vmem:[#allocation7 + $0x90] ss:$8 sps:$4 sm:$0xff]  }
  0x5a   :  { %v1007_v49 = vld [vmem:[#allocation5 + $0xe0] ss:$8 sps:$4 sm:$0xff]   ;;  %v1008_v51 = vld [vmem:[#allocation5 + $0xf4] ss:$8 sps:$4 sm:$0xff]   ;;  %v1010_v53 = vld [vmem:[#allocation5 + $0xf0] ss:$8 sps:$4 sm:$0xff]  }
  0x5b   :  { %297 = vmatpush1.bf16.msra.mxu0 %v977_v9  ;;  %v80_v54 = vld [vmem:[#allocation2] sm:$0xff]  ;;  %v1041_v55 = vld [vmem:[#allocation7 + $0xa4] ss:$8 sps:$4 sm:$0xff]   ;;  %v1043_v57 = vld [vmem:[#allocation7 + $0xa0] ss:$8 sps:$4 sm:$0xff]  }
  0x5c   :  { %298 = vmatprep.subr.bf16.mxu0 %v978_v10  ;;  %544 = vmatpush1.bf16.msra.mxu1 %v1022_v29  ;;  %v115_v56 = vpack.c.bf16 %v80_v54, %v80_v54  ;;  %v1044_v58 = vld [vmem:[#allocation7 + $0xb4] ss:$8 sps:$4 sm:$0xff]   ;;  %v1046_v59 = vld [vmem:[#allocation7 + $0xb0] ss:$8 sps:$4 sm:$0xff]   ;;  %v1047_v60 = vld [vmem:[#allocation7 + $0xc4] ss:$8 sps:$4 sm:$0xff]  }
  0x5d   :  { %545 = vmatprep.subr.bf16.mxu1 %v1023_v30  ;;  %v1049_v61 = vld [vmem:[#allocation7 + $0xc0] ss:$8 sps:$4 sm:$0xff]   ;;  %v1050_v62 = vld [vmem:[#allocation7 + $0xd4] ss:$8 sps:$4 sm:$0xff]   ;;  %v1052_v63 = vld [vmem:[#allocation7 + $0xd0] ss:$8 sps:$4 sm:$0xff]  }
  0x5e   :  { %v1053_v0 = vld [vmem:[#allocation7 + $0xe4] ss:$8 sps:$4 sm:$0xff]   ;;  %v1055_v1 = vld [vmem:[#allocation7 + $0xe0] ss:$8 sps:$4 sm:$0xff]   ;;  %v1056_v2 = vld [vmem:[#allocation7 + $0xf4] ss:$8 sps:$4 sm:$0xff]  }
  0x5f   :  { %299 = vmatpush1.bf16.msra.mxu0 %v980_v11  ;;  %v1058_v3 = vld [vmem:[#allocation7 + $0xf0] ss:$8 sps:$4 sm:$0xff]   ;;  %v1059_v4 = vld [vmem:[#allocation8] ss:$8 sps:$4 sm:$0xff]   ;;  %v1061_v5 = vld [vmem:[#allocation8 + $0x4] ss:$8 sps:$4 sm:$0xff]  }
  0x60   :  { %300 = vmatprep.subr.bf16.mxu0 %v981_v12  ;;  %546 = vmatpush1.bf16.msra.mxu1 %v1025_v33  ;;  %v1064_v6 = vld [vmem:[#allocation8 + $0x14] ss:$8 sps:$4 sm:$0xff]   ;;  %v1062_v7 = vld [vmem:[#allocation8 + $0x10] ss:$8 sps:$4 sm:$0xff]   ;;  %v1067_v8 = vld [vmem:[#allocation8 + $0x24] ss:$8 sps:$4 sm:$0xff]  }
  0x61   :  { %547 = vmatprep.subr.bf16.mxu1 %v1026_v34  ;;  %v1065_v9 = vld [vmem:[#allocation8 + $0x20] ss:$8 sps:$4 sm:$0xff]   ;;  %v1070_v10 = vld [vmem:[#allocation8 + $0x34] ss:$8 sps:$4 sm:$0xff]   ;;  %v1068_v11 = vld [vmem:[#allocation8 + $0x30] ss:$8 sps:$4 sm:$0xff]  }
  0x62   :  { %v1073_v12 = vld [vmem:[#allocation8 + $0x44] ss:$8 sps:$4 sm:$0xff]   ;;  %v1076_v14 = vld [vmem:[#allocation8 + $0x54] ss:$8 sps:$4 sm:$0xff]   ;;  %v1074_v15 = vld [vmem:[#allocation8 + $0x50] ss:$8 sps:$4 sm:$0xff]  }
  0x63   :  { %301 = vmatpush1.bf16.msra.mxu0 %v983_v13  ;;  %v1071_v13 = vld [vmem:[#allocation8 + $0x40] ss:$8 sps:$4 sm:$0xff]   ;;  %v1079_v16 = vld [vmem:[#allocation8 + $0x64] ss:$8 sps:$4 sm:$0xff]   ;;  %v1080_v19 = vld [vmem:[#allocation8 + $0x70] ss:$8 sps:$4 sm:$0xff]  }
  0x64   :  { %302 = vmatprep.subr.bf16.mxu0 %v984_v18  ;;  %548 = vmatpush1.bf16.msra.mxu1 %v1028_v36  ;;  %v1077_v17 = vld [vmem:[#allocation8 + $0x60] ss:$8 sps:$4 sm:$0xff]   ;;  %v1082_v18 = vld [vmem:[#allocation8 + $0x74] ss:$8 sps:$4 sm:$0xff]  }
  0x65   :  { %549 = vmatprep.subr.bf16.mxu1 %v1029_v38  ;;  %v1083_v21 = vld [vmem:[#allocation8 + $0x80] ss:$8 sps:$4 sm:$0xff]   ;;  %v1088_v22 = vld [vmem:[#allocation8 + $0x94] ss:$8 sps:$4 sm:$0xff]  }
  0x66   :  { %v1089_v25 = vld [vmem:[#allocation8 + $0xa0] ss:$8 sps:$4 sm:$0xff]   ;;  %v1094_v26 = vld [vmem:[#allocation8 + $0xb4] ss:$8 sps:$4 sm:$0xff]  }
  0x67   :  { %303 = vmatpush1.bf16.msra.mxu0 %v986_v20  ;;  %v1085_v20 = vld [vmem:[#allocation8 + $0x84] ss:$8 sps:$4 sm:$0xff]   ;;  %v1095_v29 = vld [vmem:[#allocation8 + $0xc0] ss:$8 sps:$4 sm:$0xff]   ;;  %v1100_v30 = vld [vmem:[#allocation8 + $0xd4] ss:$8 sps:$4 sm:$0xff]  }
  0x68   :  { %304 = vmatprep.subr.bf16.mxu0 %v987_v23  ;;  %550 = vmatpush1.bf16.msra.mxu1 %v1031_v40  ;;  %v1086_v23 = vld [vmem:[#allocation8 + $0x90] ss:$8 sps:$4 sm:$0xff]  }
  0x69   :  { %551 = vmatprep.subr.bf16.mxu1 %v1032_v42 }
  0x6b   :  { %305 = vmatpush1.bf16.msra.mxu0 %v989_v24  ;;  %v1091_v24 = vld [vmem:[#allocation8 + $0xa4] ss:$8 sps:$4 sm:$0xff]  }
  0x6c   :  { %306 = vmatprep.subr.bf16.mxu0 %v990_v27  ;;  %552 = vmatpush1.bf16.msra.mxu1 %v1034_v44  ;;  %v1092_v27 = vld [vmem:[#allocation8 + $0xb0] ss:$8 sps:$4 sm:$0xff]  }
  0x6d   :  { %553 = vmatprep.subr.bf16.mxu1 %v1035_v46 }
  0x6f   :  { %307 = vmatpush1.bf16.msra.mxu0 %v992_v28  ;;  %v1097_v28 = vld [vmem:[#allocation8 + $0xc4] ss:$8 sps:$4 sm:$0xff]  }
  0x70   :  { %308 = vmatprep.subr.bf16.mxu0 %v993_v31  ;;  %554 = vmatpush1.bf16.msra.mxu1 %v1037_v48  ;;  %v1098_v31 = vld [vmem:[#allocation8 + $0xd0] ss:$8 sps:$4 sm:$0xff]  }
  0x71   :  { %555 = vmatprep.subr.bf16.mxu1 %v1038_v50  ;;  %v1101_v50 = vld [vmem:[#allocation8 + $0xe0] ss:$8 sps:$4 sm:$0xff]  }
  0x73   :  { %309 = vmatpush1.bf16.msra.mxu0 %v995_v32  ;;  %v118_v32 = vlaneseq }
  0x74   :  { %310 = vmatprep.subr.bf16.mxu0 %v996_v35  ;;  %556 = vmatpush1.bf16.msra.mxu1 %v1040_v52  ;;  %v114_v35 = vld [vmem:[%s1360_s2] sm:$0x3] }
  0x75   :  { %557 = vmatprep.subr.bf16.mxu1 %v1041_v55  ;;  %v119_v33 = vshrl.u32 %v118_v32, 7  ;;  %v1104_v52 = vld [vmem:[#allocation8 + $0xf0] ss:$8 sps:$4 sm:$0xff]  }
  0x77   :  { %311 = vmatpush1.bf16.msra.mxu0 %v998_v37  ;;  %v120_v34 = vsub.s32 0, %v119_v33  ;;  %v124_v36 = vsub.s32 1, %v119_v33 }
  0x78   :  { %312 = vmatprep.subr.bf16.mxu0 %v999_v39  ;;  %558 = vmatpush1.bf16.msra.mxu1 %v1043_v57 }
  0x79   :  { %559 = vmatprep.subr.bf16.mxu1 %v1044_v58  ;;  %v121_v37 = vrot.slane %v114_v35, %v120_v34  ;;  %v125_v38 = vrot.slane %v114_v35, %v124_v36 }
  0x7b   :  { %313 = vmatpush1.bf16.msra.mxu0 %v1001_v41 }
  0x7c   :  { %314 = vmatprep.subr.bf16.mxu0 %v1002_v43  ;;  %560 = vmatpush1.bf16.msra.mxu1 %v1046_v59 }
  0x7d   :  { %561 = vmatprep.subr.bf16.mxu1 %v1047_v60 }
  0x7f   :  { %315 = vmatpush1.bf16.msra.mxu0 %v1004_v45 }
  0x80   :  { %316 = vmatprep.subr.bf16.mxu0 %v1005_v47  ;;  %562 = vmatpush1.bf16.msra.mxu1 %v1049_v61 }
  0x81   :  { %563 = vmatprep.subr.bf16.mxu1 %v1050_v62 }
  0x83   :  { %317 = vmatpush1.bf16.msra.mxu0 %v1007_v49  ;;  %v1103_v49 = vld [vmem:[#allocation8 + $0xe4] ss:$8 sps:$4 sm:$0xff]  }
  0x84   :  { %318 = vmatprep.subr.bf16.mxu0 %v1008_v51  ;;  %564 = vmatpush1.bf16.msra.mxu1 %v1052_v63  ;;  %v1106_v51 = vld [vmem:[#allocation8 + $0xf4] ss:$8 sps:$4 sm:$0xff]  }
  0x85   :  { %565 = vmatprep.subr.bf16.mxu1 %v1053_v0 }
  0x87   :  { %319 = vmatpush1.bf16.msra.mxu0 %v1010_v53  ;;  %v363_v53 = vld [vmem:[%s1362_s4] sm:$0x3]  ;;  %s1239_s4 = smov [#allocation10]  }
  0x88   :  { %566 = vmatpush1.bf16.msra.mxu1 %v1055_v1  ;;  %786 = vmatprep.subr.bf16.mxu0 %v1061_v5  ;;  %v370_v54 = vrot.slane %v363_v53, %v120_v34  ;;  %v374_v55 = vrot.slane %v363_v53, %v124_v36 }
  0x89   :  { %567 = vmatprep.subr.bf16.mxu1 %v1056_v2  ;;  %v612_v2 = vld [vmem:[%s1364_s6] sm:$0x3]  ;;  %s847_s6 = sshll.u32 %s1239_s4, 4  ;;  %s848_s6 = int_to_ptr.vmem [resolvable:$true] %s847_s6 }
  0x8a   :  { %321 = vmatmul.mubr.bf16.vlgmr.msra.gmra.mrb[0].mxu0 %v115_v56  ;;  %s1203_s28 = scalar_lea.vmem %s848_s6, 256  ;;  %p1208_p5 = scmp.lt.s32.totalorder %s848_s6, %s848_s6 }
  0x8b   :  { %787 = vmatpush1.bf16.msra.mxu0 %v1059_v4  ;;  %v623_v4 = vrot.slane %v612_v2, %v124_v36  ;;  %p1204_p4 = scmp.ne.s32.totalorder %s848_s6, %s1203_s28  ;;  %p1209_p6 = scmp.lt.s32.totalorder %s1203_s28, %s1203_s28 }
  0x8c   :  { %568 = vmatpush1.bf16.msra.mxu1 %v1058_v3  ;;  %788 = vmatprep.subr.bf16.mxu0 %v1064_v6  ;;  %v619_v3 = vrot.slane %v612_v2, %v120_v34 }
  0x8d   :  { %p1210_p7 = por %p1209_p6, %p1208_p5 }
  0x8f   :  { %789 = vmatpush1.bf16.msra.mxu0 %v1062_v7  ;;  %p1211_p8 = pnand %p1210_p7, %p1204_p4 }
  0x90   :  { %790 = vmatprep.subr.bf16.mxu0 %v1067_v8 }
  0x93   :  { %791 = vmatpush1.bf16.msra.mxu0 %v1065_v9 }
  0x94   :  { %792 = vmatprep.subr.bf16.mxu0 %v1070_v10 }
  0x97   :  { %793 = vmatpush1.bf16.msra.mxu0 %v1068_v11 }
  0x98   :  { %794 = vmatprep.subr.bf16.mxu0 %v1073_v12 }
  0x9b   :  { %795 = vmatpush1.bf16.msra.mxu0 %v1071_v13 }
  0x9c   :  { %796 = vmatprep.subr.bf16.mxu0 %v1076_v14 }
  0x9f   :  { %797 = vmatpush1.bf16.msra.mxu0 %v1074_v15 }
  0xa0   :  { %798 = vmatprep.subr.bf16.mxu0 %v1079_v16 }
  0xa3   :  { %799 = vmatpush1.bf16.msra.mxu0 %v1077_v17 }
  0xa4   :  { %800 = vmatprep.subr.bf16.mxu0 %v1082_v18 }
  0xa7   :  { %801 = vmatpush1.bf16.msra.mxu0 %v1080_v19 }
  0xa8   :  { %802 = vmatprep.subr.bf16.mxu0 %v1085_v20 }
  0xab   :  { %803 = vmatpush1.bf16.msra.mxu0 %v1083_v21 }
  0xac   :  { %804 = vmatprep.subr.bf16.mxu0 %v1088_v22 }
  0xaf   :  { %805 = vmatpush1.bf16.msra.mxu0 %v1086_v23 }
  0xb0   :  { %806 = vmatprep.subr.bf16.mxu0 %v1091_v24 }
  0xb3   :  { %807 = vmatpush1.bf16.msra.mxu0 %v1089_v25 }
  0xb4   :  { %808 = vmatprep.subr.bf16.mxu0 %v1094_v26 }
  0xb7   :  { %809 = vmatpush1.bf16.msra.mxu0 %v1092_v27 }
  0xb8   :  { %810 = vmatprep.subr.bf16.mxu0 %v1097_v28 }
  0xbb   :  { %811 = vmatpush1.bf16.msra.mxu0 %v1095_v29 }
  0xbc   :  { %812 = vmatprep.subr.bf16.mxu0 %v1100_v30 }
  0xbf   :  { %813 = vmatpush1.bf16.msra.mxu0 %v1098_v31 }
  0xc0   :  { %814 = vmatprep.subr.bf16.mxu0 %v1103_v49 }
  0xc3   :  { %815 = vmatpush1.bf16.msra.mxu0 %v1101_v50 }
  0xc4   :  { %816 = vmatprep.subr.bf16.mxu0 %v1106_v51 }
  0xc7   :  { %817 = vmatpush1.bf16.msra.mxu0 %v1104_v52 }
 0x15d   :  { %v322_v39 = vpop.f32.mrb[0].mxu0 }
 0x15e   :  { %v323_v40 = vadd.f32 %v322_v39, %v121_v37  ;;  %v324_v41 = vpop.f32.mrb[1].mxu0 }
 0x15f   :  { %v325_v42 = vadd.f32 %v324_v41, %v125_v38  ;;  %v326_v43 = vpop.f32.mrb[2].mxu0 }
 0x160   :  { %v329_v44 = vmax.f32 %v323_v40, 0.0  ;;  %v327_v45 = vpop.f32.mrb[3].mxu0 }
 0x161   :  { %v330_v46 = vmax.f32 %v325_v42, 0.0 }
 0x162   :  { %v364_v48 = vpack.c.bf16 %v329_v44, %v329_v44 }
 0x163   :  { %v365_v47 = vpack.c.bf16 %v330_v46, %v330_v46 }
 0x165   :  { %569 = vmatprep.mubr.bf16.mxu1 %v365_v47 }
 0x166   :  { %570 = vmatmul.mubr.bf16.vlgmr.msra.gmra.mrb[0].mxu1 %v364_v48 }
 0x239   :  { %v571_v56 = vpop.f32.mrb[0].mxu1 }
 0x23a   :  { %v572_v57 = vadd.f32 %v571_v56, %v370_v54  ;;  %v573_v58 = vpop.f32.mrb[1].mxu1 }
 0x23b   :  { %v574_v59 = vadd.f32 %v573_v58, %v374_v55  ;;  %v575_v60 = vpop.f32.mrb[2].mxu1 }
 0x23c   :  { %v578_v61 = vmax.f32 %v572_v57, 0.0  ;;  %v576_v62 = vpop.f32.mrb[3].mxu1 }
 0x23d   :  { %v579_v63 = vmax.f32 %v574_v59, 0.0 }
 0x23e   :  { %v613_v1 = vpack.c.bf16 %v578_v61, %v578_v61 }
 0x23f   :  { %v614_v0 = vpack.c.bf16 %v579_v63, %v579_v63 }
 0x241   :  { %818 = vmatprep.mubr.bf16.mxu0 %v614_v0 }
 0x242   :  { %819 = vmatmul.mubr.bf16.vlgmr.msra.gmra.mrb[4].mxu0 %v613_v1 }
 0x315   :  { %v820_v5 = vpop.f32.mrb[4].mxu0 }
 0x316   :  { %v821_v6 = vadd.f32 %v820_v5, %v619_v3  ;;  %v822_v7 = vpop.f32.mrb[5].mxu0 }
 0x317   :  { %v823_v8 = vadd.f32 %v822_v7, %v623_v4  ;;  %v824_v9 = vpop.f32.mrb[6].mxu0 }
 0x318   :  { %v954_v10 = vmul.f32 -1.442695, %v821_v6  ;;  %v825_v11 = vpop.f32.mrb[7].mxu0 }
 0x319   :  { %v955_v12 = vmul.f32 -1.442695, %v823_v8 }
 0x31a   :  { %1107 = vpow2.f32 %v954_v10 }
 0x31b   :  { %1109 = vpow2.f32 %v955_v12 }
 0x324   :  { %v1108_v13 = vpop.eup %1107 }
 0x325   :  { %v1110_v14 = vpop.eup %1109  ;;  %v833_v15 = vadd.f32 1.0, %v1108_v13 }
 0x326   :  { %v834_v16 = vadd.f32 1.0, %v1110_v14 }
 0x327   :  { %1111 = vrcp.f32 %v833_v15 }
 0x328   :  { %1113 = vrcp.f32 %v834_v16 }
 0x331   :  { %v1112_v17 = vpop.eup %1111 }
 0x332   :  { %v1114_v18 = vpop.eup %1113  ;;  %839 = vst [vmem:[#allocation10] sm:$0xff] %v1112_v17 }
 0x333   :  { %840 = vst [vmem:[#allocation10 + $0x8] sm:$0xff] %v1114_v18 }
 0x334   :  { %1214 = shalt.err (!%p1211_p8)
}
 0x335   :  { %s1215_s8 = scalar_lea.hbm %s1365_s7, 256 }
 0x336   :  { %p1216_p9 = scmp.ne.s32.totalorder %s1365_s7, %s1215_s8  ;;  %p1219_p10 = scmp.lt.u32.totalorder %s1215_s8, %s1365_s7 }
 0x338   :  { %p1221_p11 = pnand %p1219_p10, %p1216_p9 }
 0x33a   :  { %1224 = shalt.err (!%p1221_p11)
}
 0x33b   :  { %850 = dma.vmem_to_hbm [thread:$0]  %s848_s6, 256, %s1365_s7, [#allocation4]  }
 0x33c   :  { %1231 = dma.done.wait [#allocation4], 256  }
 0x33d   :  { %1232 = vsyncadd [#allocation4], 4294967040 }
 0x33e   :  { %854 = vsyncpa [#allocation3], 1 }
 0x33f   :  { %855 = vsyncpa [#allocation6], 1 }
 0x340   :  { %856 = vsyncpa [#allocation9], 1 }
 0x341   :  { %857 = vsyncpa [#allocation4], 1 }

</bundles_post_ra>
